<compile_context>
chip_gen: v7x
topology: tpu7x:2x2x1
jax: 0.10.0
libtpu: 0.0.40
codegen_flags: <defaults>
</compile_context>

<pallas_src>
import functools

import jax
import jax.numpy as jnp
from jax.experimental import pallas as pl
from jax.experimental.pallas import tpu as pltpu

# ----------------------------- model sizes -----------------------------------
D = 4          # theta dimension (even, for the coupling split)
HALF = D // 2
C = 16         # context ("flux") dimension
H = 32         # hidden width (embedding MLP and coupling conditioners)
E = 8          # context-embedding dimension
TILE_B = 128   # batch rows per grid step (sublane-aligned; output row = 128 lanes)

_LOG_2PI = 1.8378770664093453

# --------------------- packed-parameter slab layout ---------------------------
# Wide slab [R_WIDE, H] f32; every block starts on an 8-row boundary.
EW1_R = 0       # e_w1                  [C, H]
EB1_R = 16      # e_b1                  [1, H]
C1A_R = 24      # c1_w1a                [HALF, H]
C1WH_R = 32     # e_w2 @ c1_w1b         [H, H]   (embedding proj folded in)
C1B_R = 64      # c1_b1 + e_b2 @ c1_w1b [1, H]
C2A_R = 72      # c2_w1a                [HALF, H]
C2WH_R = 80     # e_w2 @ c2_w1b         [H, H]
C2B_R = 112     # c2_b1 + e_b2 @ c2_w1b [1, H]
R_WIDE = 120

# Narrow slab [R_NARROW, HALF] f32 (scale/shift heads split column-wise).
C1WS_R, C1WT_R, C2WS_R, C2WT_R = 0, 32, 64, 96
C1BS_R, C1BT_R, C2BS_R, C2BT_R = 128, 136, 144, 152
R_NARROW = 160


def _gelu(x):
    # tanh-approx GELU (EUP tanh + VPU elementwise)
    return 0.5 * x * (1.0 + jnp.tanh(0.7978845608028654 * (x + 0.044715 * x * x * x)))


# ----------------------------- kernel -----------------------------------------
def npe_kernel(x1_ref, x2_ref, flux_ref, ww_ref, wn_ref, out_ref):
    x1 = x1_ref[...]                     # [TILE_B, HALF]
    x2 = x2_ref[...]                     # [TILE_B, HALF]
    flux = flux_ref[...]                 # [TILE_B, C]

    # Static slices of the VMEM-resident weight slabs (all 8-row aligned).
    e_w1 = ww_ref[EW1_R:EW1_R + C, :]
    e_b1 = ww_ref[EB1_R:EB1_R + 1, :]
    c1_w1a = ww_ref[C1A_R:C1A_R + HALF, :]
    c1_wh = ww_ref[C1WH_R:C1WH_R + H, :]
    c1_b1 = ww_ref[C1B_R:C1B_R + 1, :]
    c2_w1a = ww_ref[C2A_R:C2A_R + HALF, :]
    c2_wh = ww_ref[C2WH_R:C2WH_R + H, :]
    c2_b1 = ww_ref[C2B_R:C2B_R + 1, :]

    c1_ws = wn_ref[C1WS_R:C1WS_R + H, :]
    c1_wt = wn_ref[C1WT_R:C1WT_R + H, :]
    c2_ws = wn_ref[C2WS_R:C2WS_R + H, :]
    c2_wt = wn_ref[C2WT_R:C2WT_R + H, :]
    c1_bs = wn_ref[C1BS_R:C1BS_R + 1, :]
    c1_bt = wn_ref[C1BT_R:C1BT_R + 1, :]
    c2_bs = wn_ref[C2BS_R:C2BS_R + 1, :]
    c2_bt = wn_ref[C2BT_R:C2BT_R + 1, :]

    dot = functools.partial(jnp.dot, preferred_element_type=jnp.float32)

    # Context-embedding hidden layer (output projection is folded into the
    # coupling conditioners, so `emb` is never materialized).
    h = _gelu(dot(flux, e_w1) + e_b1)                                  # [TILE_B, H]

    # Coupling layer 1: transform x2 conditioned on (x1, context).
    h1 = jnp.maximum(dot(x1, c1_w1a) + dot(h, c1_wh) + c1_b1, 0.0)     # [TILE_B, H]
    s1 = jnp.tanh(dot(h1, c1_ws) + c1_bs)                              # [TILE_B, HALF]
    t1 = dot(h1, c1_wt) + c1_bt                                        # [TILE_B, HALF]
    y2 = x2 * jnp.exp(s1) + t1

    # Coupling layer 2: transform x1 conditioned on (y2, context).
    h2 = jnp.maximum(dot(y2, c2_w1a) + dot(h, c2_wh) + c2_b1, 0.0)
    s2 = jnp.tanh(dot(h2, c2_ws) + c2_bs)
    t2 = dot(h2, c2_wt) + c2_bt
    y1 = x1 * jnp.exp(s2) + t2

    # Standard-normal base log-prob + log|det J|.
    contrib = s1 + s2 - 0.5 * (y1 * y1 + y2 * y2)                      # [TILE_B, HALF]
    logp = jnp.sum(contrib, axis=1, keepdims=True) - 0.5 * D * _LOG_2PI  # [TILE_B, 1]

    # Lane-dense writeback: (1, TILE_B) row with batch on the lane axis.
    out_ref[0] = jnp.transpose(logp)


# ----------------------------- parameters -------------------------------------
def init_params():
    keys = jax.random.split(jax.random.PRNGKey(42), 16)

    def lin(k, fan_in, fan_out):
        return 0.2 * jax.random.normal(k, (fan_in, fan_out), jnp.float32)

    return dict(
        e_w1=lin(keys[0], C, H), e_b1=jnp.zeros((1, H), jnp.float32),
        e_w2=lin(keys[1], H, E), e_b2=jnp.zeros((1, E), jnp.float32),

        c1_w1a=lin(keys[2], HALF, H), c1_w1b=lin(keys[3], E, H),
        c1_b1=jnp.zeros((1, H), jnp.float32),
        c1_w2=lin(keys[4], H, D), c1_b2=jnp.zeros((1, D), jnp.float32),

        c2_w1a=lin(keys[5], HALF, H), c2_w1b=lin(keys[6], E, H),
        c2_b1=jnp.zeros((1, H), jnp.float32),
        c2_w2=lin(keys[7], H, D), c2_b2=jnp.zeros((1, D), jnp.float32),
    )


def pack_params(params):
    """Host-side: fold the embedding output projection into the coupling
    conditioners and pack everything into two contiguous slabs."""
    c1_wh = params["e_w2"] @ params["c1_w1b"]                      # [H, H]
    c1_b1 = params["c1_b1"] + params["e_b2"] @ params["c1_w1b"]    # [1, H]
    c2_wh = params["e_w2"] @ params["c2_w1b"]
    c2_b1 = params["c2_b1"] + params["e_b2"] @ params["c2_w1b"]

    ww = jnp.zeros((R_WIDE, H), jnp.float32)
    ww = ww.at[EW1_R:EW1_R + C].set(params["e_w1"])
    ww = ww.at[EB1_R:EB1_R + 1].set(params["e_b1"])
    ww = ww.at[C1A_R:C1A_R + HALF].set(params["c1_w1a"])
    ww = ww.at[C1WH_R:C1WH_R + H].set(c1_wh)
    ww = ww.at[C1B_R:C1B_R + 1].set(c1_b1)
    ww = ww.at[C2A_R:C2A_R + HALF].set(params["c2_w1a"])
    ww = ww.at[C2WH_R:C2WH_R + H].set(c2_wh)
    ww = ww.at[C2B_R:C2B_R + 1].set(c2_b1)

    wn = jnp.zeros((R_NARROW, HALF), jnp.float32)
    wn = wn.at[C1WS_R:C1WS_R + H].set(params["c1_w2"][:, :HALF])   # scale head
    wn = wn.at[C1WT_R:C1WT_R + H].set(params["c1_w2"][:, HALF:])   # shift head
    wn = wn.at[C2WS_R:C2WS_R + H].set(params["c2_w2"][:, :HALF])
    wn = wn.at[C2WT_R:C2WT_R + H].set(params["c2_w2"][:, HALF:])
    wn = wn.at[C1BS_R:C1BS_R + 1].set(params["c1_b2"][:, :HALF])
    wn = wn.at[C1BT_R:C1BT_R + 1].set(params["c1_b2"][:, HALF:])
    wn = wn.at[C2BS_R:C2BS_R + 1].set(params["c2_b2"][:, :HALF])
    wn = wn.at[C2BT_R:C2BT_R + 1].set(params["c2_b2"][:, HALF:])
    return ww, wn


# ----------------------------- wrapper -----------------------------------------
@jax.jit
def _npe_pallas(x1, x2, flux, w_wide, w_narrow):
    bp = x1.shape[0]
    g = bp // TILE_B
    return pl.pallas_call(
        npe_kernel,
        out_shape=jax.ShapeDtypeStruct((g, 1, TILE_B), jnp.float32),
        grid_spec=pltpu.PrefetchScalarGridSpec(
            num_scalar_prefetch=0,
            grid=(g,),
            in_specs=[
                pl.BlockSpec((TILE_B, HALF), lambda i: (i, 0)),      # x1
                pl.BlockSpec((TILE_B, HALF), lambda i: (i, 0)),      # x2
                pl.BlockSpec((TILE_B, C), lambda i: (i, 0)),         # flux
                pl.BlockSpec((R_WIDE, H), lambda i: (0, 0)),         # wide slab (resident)
                pl.BlockSpec((R_NARROW, HALF), lambda i: (0, 0)),    # narrow slab (resident)
            ],
            out_specs=pl.BlockSpec((1, 1, TILE_B), lambda i: (i, 0, 0)),
        ),
        compiler_params=pltpu.CompilerParams(
            dimension_semantics=("parallel",)),
    )(x1, x2, flux, w_wide, w_narrow)


def npe_log_prob(theta, context, packed_params):
    """Forward pass of NPENetwork: log p(theta | context)."""
    w_wide, w_narrow = packed_params
    flux = context["flux"]
    bn = theta.shape[0]
    g = pl.cdiv(bn, TILE_B)
    pad = g * TILE_B - bn

    x1 = theta[:, :HALF]
    x2 = theta[:, HALF:]
    if pad:
        x1 = jnp.pad(x1, ((0, pad), (0, 0)))
        x2 = jnp.pad(x2, ((0, pad), (0, 0)))
        flux = jnp.pad(flux, ((0, pad), (0, 0)))

    out = _npe_pallas(x1, x2, flux, w_wide, w_narrow)       # [g, 1, TILE_B]
    return out.reshape(g * TILE_B)[:bn]


# ----------------------------- pure-JAX reference -------------------------------
def npe_log_prob_ref(theta, context, params):
    flux = context["flux"]
    h = _gelu(flux @ params["e_w1"] + params["e_b1"])
    emb = h @ params["e_w2"] + params["e_b2"]
    x1, x2 = theta[:, :HALF], theta[:, HALF:]

    h1 = jnp.maximum(x1 @ params["c1_w1a"] + emb @ params["c1_w1b"] + params["c1_b1"], 0.0)
    p1 = h1 @ params["c1_w2"] + params["c1_b2"]
    s1, t1 = jnp.tanh(p1[:, :HALF]), p1[:, HALF:]
    y2 = x2 * jnp.exp(s1) + t1
    logdet = jnp.sum(s1, axis=1)

    h2 = jnp.maximum(y2 @ params["c2_w1a"] + emb @ params["c2_w1b"] + params["c2_b1"], 0.0)
    p2 = h2 @ params["c2_w2"] + params["c2_b2"]
    s2, t2 = jnp.tanh(p2[:, :HALF]), p2[:, HALF:]
    y1 = x1 * jnp.exp(s2) + t2
    logdet = logdet + jnp.sum(s2, axis=1)

    zsq = jnp.sum(y1 * y1, axis=1) + jnp.sum(y2 * y2, axis=1)
    return -0.5 * zsq - 0.5 * D * _LOG_2PI + logdet


if __name__ == "__main__":
    B = 200   # not a multiple of TILE_B on purpose (exercises the padding path)
    key = jax.random.PRNGKey(0)
    k_theta, k_flux = jax.random.split(key)
    theta = jax.random.normal(k_theta, (B, D), jnp.float32)
    context = {"flux": jax.random.normal(k_flux, (B, C), jnp.float32)}

    params = init_params()
    packed = pack_params(params)

    log_prob = jax.block_until_ready(npe_log_prob(theta, context, packed))
    ref = jax.block_until_ready(npe_log_prob_ref(theta, context, params))

    assert log_prob.shape == (B,)
    assert jnp.allclose(log_prob, ref, atol=1e-4, rtol=1e-4), (log_prob[:8], ref[:8])
    print("KERNEL_OK")
</pallas_src>

<mosaic_0001>
module attributes {stable_mosaic.version = 11 : i64} {
  func.func @npe_kernel(%arg0: i32, %arg1: memref<128x2xf32, #tpu.memory_space<vmem>>, %arg2: memref<128x2xf32, #tpu.memory_space<vmem>>, %arg3: memref<128x16xf32, #tpu.memory_space<vmem>>, %arg4: memref<120x32xf32, #tpu.memory_space<vmem>>, %arg5: memref<160x2xf32, #tpu.memory_space<vmem>>, %arg6: memref<1x1x128xf32, #tpu.memory_space<vmem>>) attributes {dimension_semantics = [#tpu.dimension_semantics<parallel>], iteration_bounds = array<i64: 2>, scalar_prefetch = 0 : i64, scratch_operands = 0 : i64, tpu.core_type = #tpu.core_type<tc>, window_params = [{transform_indices = @transform_0, window_bounds = array<i64: 128, 2>}, {transform_indices = @transform_1, window_bounds = array<i64: 128, 2>}, {transform_indices = @transform_2, window_bounds = array<i64: 128, 16>}, {pipeline_mode = #tpu.pipeline_mode<synchronous>, transform_indices = @transform_3, window_bounds = array<i64: 120, 32>}, {pipeline_mode = #tpu.pipeline_mode<synchronous>, transform_indices = @transform_4, window_bounds = array<i64: 160, 2>}, {transform_indices = @transform_5, window_bounds = array<i64: 1, 1, 128>}]} {
    %c0 = arith.constant 0 : index
    %c0_0 = arith.constant 0 : index
    %0 = vector.load %arg1[%c0, %c0_0] : memref<128x2xf32, #tpu.memory_space<vmem>>, vector<128x2xf32>
    %c0_1 = arith.constant 0 : index
    %c0_2 = arith.constant 0 : index
    %1 = vector.load %arg2[%c0_1, %c0_2] : memref<128x2xf32, #tpu.memory_space<vmem>>, vector<128x2xf32>
    %c0_3 = arith.constant 0 : index
    %c0_4 = arith.constant 0 : index
    %2 = vector.load %arg3[%c0_3, %c0_4] : memref<128x16xf32, #tpu.memory_space<vmem>>, vector<128x16xf32>
    %c0_5 = arith.constant 0 : index
    %c0_6 = arith.constant 0 : index
    %3 = vector.load %arg4[%c0_5, %c0_6] : memref<120x32xf32, #tpu.memory_space<vmem>>, vector<16x32xf32>
    %c16 = arith.constant 16 : index
    %c0_7 = arith.constant 0 : index
    %4 = vector.load %arg4[%c16, %c0_7] : memref<120x32xf32, #tpu.memory_space<vmem>>, vector<1x32xf32>
    %c24 = arith.constant 24 : index
    %c0_8 = arith.constant 0 : index
    %5 = vector.load %arg4[%c24, %c0_8] : memref<120x32xf32, #tpu.memory_space<vmem>>, vector<2x32xf32>
    %c32 = arith.constant 32 : index
    %c0_9 = arith.constant 0 : index
    %6 = vector.load %arg4[%c32, %c0_9] : memref<120x32xf32, #tpu.memory_space<vmem>>, vector<32x32xf32>
    %c64 = arith.constant 64 : index
    %c0_10 = arith.constant 0 : index
    %7 = vector.load %arg4[%c64, %c0_10] : memref<120x32xf32, #tpu.memory_space<vmem>>, vector<1x32xf32>
    %c72 = arith.constant 72 : index
    %c0_11 = arith.constant 0 : index
    %8 = vector.load %arg4[%c72, %c0_11] : memref<120x32xf32, #tpu.memory_space<vmem>>, vector<2x32xf32>
    %c80 = arith.constant 80 : index
    %c0_12 = arith.constant 0 : index
    %9 = vector.load %arg4[%c80, %c0_12] : memref<120x32xf32, #tpu.memory_space<vmem>>, vector<32x32xf32>
    %c112 = arith.constant 112 : index
    %c0_13 = arith.constant 0 : index
    %10 = vector.load %arg4[%c112, %c0_13] : memref<120x32xf32, #tpu.memory_space<vmem>>, vector<1x32xf32>
    %c0_14 = arith.constant 0 : index
    %c0_15 = arith.constant 0 : index
    %11 = vector.load %arg5[%c0_14, %c0_15] : memref<160x2xf32, #tpu.memory_space<vmem>>, vector<32x2xf32>
    %c32_16 = arith.constant 32 : index
    %c0_17 = arith.constant 0 : index
    %12 = vector.load %arg5[%c32_16, %c0_17] : memref<160x2xf32, #tpu.memory_space<vmem>>, vector<32x2xf32>
    %c64_18 = arith.constant 64 : index
    %c0_19 = arith.constant 0 : index
    %13 = vector.load %arg5[%c64_18, %c0_19] : memref<160x2xf32, #tpu.memory_space<vmem>>, vector<32x2xf32>
    %c96 = arith.constant 96 : index
    %c0_20 = arith.constant 0 : index
    %14 = vector.load %arg5[%c96, %c0_20] : memref<160x2xf32, #tpu.memory_space<vmem>>, vector<32x2xf32>
    %c128 = arith.constant 128 : index
    %c0_21 = arith.constant 0 : index
    %15 = vector.load %arg5[%c128, %c0_21] : memref<160x2xf32, #tpu.memory_space<vmem>>, vector<1x2xf32>
    %c136 = arith.constant 136 : index
    %c0_22 = arith.constant 0 : index
    %16 = vector.load %arg5[%c136, %c0_22] : memref<160x2xf32, #tpu.memory_space<vmem>>, vector<1x2xf32>
    %c144 = arith.constant 144 : index
    %c0_23 = arith.constant 0 : index
    %17 = vector.load %arg5[%c144, %c0_23] : memref<160x2xf32, #tpu.memory_space<vmem>>, vector<1x2xf32>
    %c152 = arith.constant 152 : index
    %c0_24 = arith.constant 0 : index
    %18 = vector.load %arg5[%c152, %c0_24] : memref<160x2xf32, #tpu.memory_space<vmem>>, vector<1x2xf32>
    %cst = arith.constant dense<0.000000e+00> : vector<128x32xf32>
    %19 = tpu.matmul %2, %3, %cst {dimension_numbers = #tpu.dot_dimension_numbers<[1], [0], [0], [1], [0, 0, 1, 1], [], []>} : vector<128x16xf32>, vector<16x32xf32>, vector<128x32xf32> -> vector<128x32xf32>
    %20 = vector.broadcast %4 : vector<1x32xf32> to vector<128x32xf32>
    %21 = arith.addf %19, %20 : vector<128x32xf32>
    %cst_25 = arith.constant 5.000000e-01 : f32
    %22 = vector.broadcast %cst_25 : f32 to vector<128x32xf32>
    %23 = arith.mulf %22, %21 : vector<128x32xf32>
    %cst_26 = arith.constant 4.471500e-02 : f32
    %24 = vector.broadcast %cst_26 : f32 to vector<128x32xf32>
    %25 = arith.mulf %24, %21 : vector<128x32xf32>
    %26 = arith.mulf %25, %21 : vector<128x32xf32>
    %27 = arith.mulf %26, %21 : vector<128x32xf32>
    %28 = arith.addf %21, %27 : vector<128x32xf32>
    %cst_27 = arith.constant 0.797884583 : f32
    %29 = vector.broadcast %cst_27 : f32 to vector<128x32xf32>
    %30 = arith.mulf %29, %28 : vector<128x32xf32>
    %31 = math.tanh %30 : vector<128x32xf32>
    %cst_28 = arith.constant 1.000000e+00 : f32
    %32 = vector.broadcast %cst_28 : f32 to vector<128x32xf32>
    %33 = arith.addf %32, %31 : vector<128x32xf32>
    %34 = arith.mulf %23, %33 : vector<128x32xf32>
    %cst_29 = arith.constant dense<0.000000e+00> : vector<128x32xf32>
    %35 = tpu.matmul %0, %5, %cst_29 {dimension_numbers = #tpu.dot_dimension_numbers<[1], [0], [0], [1], [0, 0, 1, 1], [], []>} : vector<128x2xf32>, vector<2x32xf32>, vector<128x32xf32> -> vector<128x32xf32>
    %cst_30 = arith.constant dense<0.000000e+00> : vector<128x32xf32>
    %36 = tpu.matmul %34, %6, %cst_30 {dimension_numbers = #tpu.dot_dimension_numbers<[1], [0], [0], [1], [0, 0, 1, 1], [], []>} : vector<128x32xf32>, vector<32x32xf32>, vector<128x32xf32> -> vector<128x32xf32>
    %37 = arith.addf %35, %36 : vector<128x32xf32>
    %38 = vector.broadcast %7 : vector<1x32xf32> to vector<128x32xf32>
    %39 = arith.addf %37, %38 : vector<128x32xf32>
    %cst_31 = arith.constant 0.000000e+00 : f32
    %40 = vector.broadcast %cst_31 : f32 to vector<128x32xf32>
    %41 = arith.maximumf %39, %40 : vector<128x32xf32>
    %cst_32 = arith.constant dense<0.000000e+00> : vector<128x2xf32>
    %42 = tpu.matmul %41, %11, %cst_32 {dimension_numbers = #tpu.dot_dimension_numbers<[1], [0], [0], [1], [0, 0, 1, 1], [], []>} : vector<128x32xf32>, vector<32x2xf32>, vector<128x2xf32> -> vector<128x2xf32>
    %43 = vector.broadcast %15 : vector<1x2xf32> to vector<128x2xf32>
    %44 = arith.addf %42, %43 : vector<128x2xf32>
    %45 = math.tanh %44 : vector<128x2xf32>
    %cst_33 = arith.constant dense<0.000000e+00> : vector<128x2xf32>
    %46 = tpu.matmul %41, %12, %cst_33 {dimension_numbers = #tpu.dot_dimension_numbers<[1], [0], [0], [1], [0, 0, 1, 1], [], []>} : vector<128x32xf32>, vector<32x2xf32>, vector<128x2xf32> -> vector<128x2xf32>
    %47 = vector.broadcast %16 : vector<1x2xf32> to vector<128x2xf32>
    %48 = arith.addf %46, %47 : vector<128x2xf32>
    %49 = math.exp %45 : vector<128x2xf32>
    %50 = arith.mulf %1, %49 : vector<128x2xf32>
    %51 = arith.addf %50, %48 : vector<128x2xf32>
    %cst_34 = arith.constant dense<0.000000e+00> : vector<128x32xf32>
    %52 = tpu.matmul %51, %8, %cst_34 {dimension_numbers = #tpu.dot_dimension_numbers<[1], [0], [0], [1], [0, 0, 1, 1], [], []>} : vector<128x2xf32>, vector<2x32xf32>, vector<128x32xf32> -> vector<128x32xf32>
    %cst_35 = arith.constant dense<0.000000e+00> : vector<128x32xf32>
    %53 = tpu.matmul %34, %9, %cst_35 {dimension_numbers = #tpu.dot_dimension_numbers<[1], [0], [0], [1], [0, 0, 1, 1], [], []>} : vector<128x32xf32>, vector<32x32xf32>, vector<128x32xf32> -> vector<128x32xf32>
    %54 = arith.addf %52, %53 : vector<128x32xf32>
    %55 = vector.broadcast %10 : vector<1x32xf32> to vector<128x32xf32>
    %56 = arith.addf %54, %55 : vector<128x32xf32>
    %cst_36 = arith.constant 0.000000e+00 : f32
    %57 = vector.broadcast %cst_36 : f32 to vector<128x32xf32>
    %58 = arith.maximumf %56, %57 : vector<128x32xf32>
    %cst_37 = arith.constant dense<0.000000e+00> : vector<128x2xf32>
    %59 = tpu.matmul %58, %13, %cst_37 {dimension_numbers = #tpu.dot_dimension_numbers<[1], [0], [0], [1], [0, 0, 1, 1], [], []>} : vector<128x32xf32>, vector<32x2xf32>, vector<128x2xf32> -> vector<128x2xf32>
    %60 = vector.broadcast %17 : vector<1x2xf32> to vector<128x2xf32>
    %61 = arith.addf %59, %60 : vector<128x2xf32>
    %62 = math.tanh %61 : vector<128x2xf32>
    %cst_38 = arith.constant dense<0.000000e+00> : vector<128x2xf32>
    %63 = tpu.matmul %58, %14, %cst_38 {dimension_numbers = #tpu.dot_dimension_numbers<[1], [0], [0], [1], [0, 0, 1, 1], [], []>} : vector<128x32xf32>, vector<32x2xf32>, vector<128x2xf32> -> vector<128x2xf32>
    %64 = vector.broadcast %18 : vector<1x2xf32> to vector<128x2xf32>
    %65 = arith.addf %63, %64 : vector<128x2xf32>
    %66 = math.exp %62 : vector<128x2xf32>
    %67 = arith.mulf %0, %66 : vector<128x2xf32>
    %68 = arith.addf %67, %65 : vector<128x2xf32>
    %69 = arith.addf %45, %62 : vector<128x2xf32>
    %70 = arith.mulf %68, %68 : vector<128x2xf32>
    %71 = arith.mulf %51, %51 : vector<128x2xf32>
    %72 = arith.addf %70, %71 : vector<128x2xf32>
    %cst_39 = arith.constant 5.000000e-01 : f32
    %73 = vector.broadcast %cst_39 : f32 to vector<128x2xf32>
    %74 = arith.mulf %73, %72 : vector<128x2xf32>
    %75 = arith.subf %69, %74 : vector<128x2xf32>
    %cst_40 = arith.constant dense<0.000000e+00> : vector<128xf32>
    %76 = vector.multi_reduction <add>, %75, %cst_40 [1] : vector<128x2xf32> to vector<128xf32>
    %77 = vector.shape_cast %76 : vector<128xf32> to vector<128x1xf32>
    %cst_41 = arith.constant 3.67575407 : f32
    %78 = vector.broadcast %cst_41 : f32 to vector<128x1xf32>
    %79 = arith.subf %77, %78 : vector<128x1xf32>
    %80 = tpu.transpose %79, [1, 0] : vector<128x1xf32> -> vector<1x128xf32>
    %c0_42 = arith.constant 0 : index
    %c0_43 = arith.constant 0 : index
    %c0_44 = arith.constant 0 : index
    %81 = vector.load %arg6[%c0_42, %c0_43, %c0_44] : memref<1x1x128xf32, #tpu.memory_space<vmem>>, vector<1x1x128xf32>
    %82 = vector.shape_cast %81 : vector<1x1x128xf32> to vector<1x128xf32>
    %83 = vector.shape_cast %80 : vector<1x128xf32> to vector<1x1x128xf32>
    tpu.vector_store %arg6[%c0_42, %c0_43, %c0_44], %83 {strides = array<i32>} : memref<1x1x128xf32, #tpu.memory_space<vmem>>, vector<1x1x128xf32>,
    return
  }
  func.func @transform_0(%arg0: i32) -> (i32, i32) {
    %c0_i32 = arith.constant 0 : i32
    %c0_i32_0 = arith.constant 0 : i32
    return %arg0, %c0_i32 : i32, i32
  }
  func.func @transform_1(%arg0: i32) -> (i32, i32) {
    %c0_i32 = arith.constant 0 : i32
    %c0_i32_0 = arith.constant 0 : i32
    return %arg0, %c0_i32 : i32, i32
  }
  func.func @transform_2(%arg0: i32) -> (i32, i32) {
    %c0_i32 = arith.constant 0 : i32
    %c0_i32_0 = arith.constant 0 : i32
    return %arg0, %c0_i32 : i32, i32
  }
  func.func @transform_3(%arg0: i32) -> (i32, i32) {
    %c0_i32 = arith.constant 0 : i32
    %c0_i32_0 = arith.constant 0 : i32
    %c0_i32_1 = arith.constant 0 : i32
    return %c0_i32, %c0_i32_0 : i32, i32
  }
  func.func @transform_4(%arg0: i32) -> (i32, i32) {
    %c0_i32 = arith.constant 0 : i32
    %c0_i32_0 = arith.constant 0 : i32
    %c0_i32_1 = arith.constant 0 : i32
    return %c0_i32, %c0_i32_0 : i32, i32
  }
  func.func @transform_5(%arg0: i32) -> (i32, i32, i32) {
    %c0_i32 = arith.constant 0 : i32
    %c0_i32_0 = arith.constant 0 : i32
    %c0_i32_1 = arith.constant 0 : i32
    return %arg0, %c0_i32, %c0_i32_0 : i32, i32, i32
  }
}

</mosaic_0001>

<bundles_post_ra>
// kernel: _npe_pallas.1
= control target key start
LH: loop header
LB: loop body
LE: loop exit
PB: predicated region body
PF: predicated region fallthrough
CT: control target
= control target key end

     0   :  { %10 = vsyncpa [#allocation3], 0  ;;  %s4673_s0 = inlined_call_operand.vmem [shape: f32[256,2], index: 0, kind: input, shape index: {}]   ;;  %s4674_s1 = inlined_call_operand.vmem [shape: f32[256,2], index: 1, kind: input, shape index: {}]   ;;  %s4675_s2 = inlined_call_operand.vmem [shape: f32[256,16], index: 2, kind: input, shape index: {}]   ;;  %s4676_s3 = inlined_call_operand.vmem [shape: f32[120,32], index: 3, kind: input, shape index: {}]   ;;  %s4677_s4 = inlined_call_operand.vmem [shape: f32[160,2], index: 4, kind: input, shape index: {}]   ;;  %s4678_s5 = inlined_call_operand.hbm [shape: f32[2,1,128], index: 5, kind: output, shape index: {}]  }
   0x1   :  { %12 = vsyncpa [#allocation3 + $0x1], 0  ;;  %s3657_s18 = smov 0   ;;  %s3659_s19 = smov 0  }
   0x2   :  { %s3661_s20 = smov 0   ;;  %s3663_s21 = smov 0  }
   0x3 LB: > { %s2634_s22 = sadd.s32 4294967295, %s3624_s21   ;;  %s2635_s23 = sadd.s32 4294967294, %s3624_s21   ;;  %s3624_s21 = sphi %s3663_s21, %s4684_s21   ;;  %s3620_s20 = sphi %s3661_s20, %s4683_s20   ;;  %s3616_s19 = sphi %s3659_s19, %s4682_s19   ;;  %s3612_s18 = sphi %s3657_s18, %s4681_s18  }
   0x4   : > { %s3680_s24 = sadd.s32 1, %s3624_s21   ;;  %s145_s25 = sadd.s32 1, %s3620_s20 }
   0x5   : > { %s142_s26 = ssub.s32 %s3624_s21, %s3680_s24  ;;  %p155_p0 = scmp.ne.s32.totalorder %s3620_s20, %s3616_s19 }
   0x6   : > { %p143_p1 = scmp.eq.s32.totalorder %s142_s26, 0  ;;  %p156_p2 = scmp.eq.s32.totalorder %s2634_s22, 1 }
   0x7   : > { %p161_p3 = scmp.ne.s32.totalorder %s3616_s19, %s3612_s18  ;;  %p162_p4 = scmp.eq.s32.totalorder %s2635_s23, 1 }
   0x8   : > { %s3690_s27 = scalar_select %p143_p1, %s3620_s20, %s145_s25  }
   0x9   : > { %p3692_p5 = por %p156_p2, %p155_p0  ;;  %p3696_p6 = por %p162_p4, %p161_p3 }
   0xa   : > { %p2638_p7 = scmp.ge.s32.totalorder %s3624_s21, 1  ;;  %p213_p8 = scmp.lt.s32.totalorder %s3624_s21, 3 }
   0xc   : > { %p214_p9 = pnand %p2638_p7, %p213_p8 }
   0xd   : > { %v316_v0 = vld [vmem:[%s4676_s3] sm:$0xff] (!%p214_p9)  ;;  %v317_v1 = vld [vmem:[%s4676_s3 + $0x8] sm:$0xff] (!%p214_p9)  ;;  %s3708_s9 = sshll.u32 (!%p214_p9), %s2634_s22, 4  ;;  %vm355_vm0 = vcmask (!%p214_p9), 130048   ;;  %v322_v22 = vld [vmem:[%s4676_s3 + $0x30] sm:$0xff] (!%p214_p9)  ;;  %vm936_vm1 = vcmask (!%p214_p9), 1041408  }
   0xe   : > { %217 = sbr.rel (%p214_p9) target bundleno = 1538 (0x602), region = 40  ;;  %v3261_v2 = vpack.c.bf16 (!%p214_p9), %v317_v1, %v316_v0  ;;  %p251_p10 = scmp.lt.s32.totalorder (!%p214_p9), %s3708_s9, 31  ;;  %v320_v19 = vld [vmem:[%s4676_s3 + $0x20] sm:$0xff] (!%p214_p9)  ;;  %v321_v20 = vld [vmem:[%s4676_s3 + $0x28] sm:$0xff] (!%p214_p9)  ;;  %v323_v23 = vld [vmem:[%s4676_s3 + $0x38] sm:$0xff] (!%p214_p9)  ;;  %vm693_vm2 = vcmask (!%p214_p9), 261120  }
   0xf   : > { %v3265_v21 = vpack.c.bf16 (!%p214_p9), %v321_v20, %v320_v19  ;;  %v3269_v24 = vpack.c.bf16 (!%p214_p9), %v323_v23, %v322_v22  ;;  %v3749_v25 = vld [vmem:[%s4676_s3 + $0x18] sm:$0x3] (!%p214_p9)  ;;  %v3756_v26 = vld [vmem:[%s4676_s3 + $0x10] ss:$0 sm:$0xff] (!%p214_p9)  ;;  %vm887_vm3 = vcmask (!%p214_p9), 15360   ;;  %s4633_s17 = scalar_lea.hbm (!%p214_p9), %s4678_s5, %s3708_s9  ;;  %s3626_s25 = smov (!%p214_p9), [#allocation2]  }
  0x10   : > { %3262 = vmatprep.subr.bf16.mxu0 (!%p214_p9), %v3261_v2  ;;  %3313 = vmatprep.subr.bf16.mxu1 (!%p214_p9), %v3261_v2  ;;  %s3566_s26 = sshll.u32 (!%p214_p9), %s3626_s25, 4  ;;  %s3567_s26 = int_to_ptr.vmem [resolvable:$false] %s3566_s26 }
  0x11   : > { %3264 = vmatpush3.bf16.msra.mxu0 (!%p214_p9), %v3261_v2  ;;  %3314 = vmatpush3.bf16.msra.mxu1 (!%p214_p9), %v3261_v2  ;;  %s3568_s30 = scalar_lea.vmem (!%p214_p9), %s3567_s26, 32 }
  0x12   : > { %3266 = vmatprep.subr.bf16.mxu1 (!%p214_p9), %v3265_v21 }
  0x15   : > { %s252_s10 = scalar_select %p251_p10, %s3708_s9, 31 }
  0x17   : > { %s3712_s11 = sshll.u32 %s252_s10, 3 }
  0x18   : > { %s266_s14 = scalar_lea.vmem %s4675_s2, %s3712_s11  ;;  %s3964_s10 = scalar_lea.vmem %s4673_s0, %s3712_s11 }
  0x19   : > { %v300_v3 = vld [vmem:[%s266_s14] sm:$0xff]  ;;  %v301_v5 = vld [vmem:[%s266_s14 + $0x8] sm:$0xff]  ;;  %v302_v7 = vld [vmem:[%s266_s14 + $0x10] sm:$0xff]  ;;  %s4183_s12 = scalar_lea.vmem %s4674_s1, %s3712_s11 }
  0x1a   : > { %v308_v4 = vld [vmem:[%s266_s14 + $0x40] sm:$0xff]  ;;  %2993 = vmatprep.mubr.msk.f32.mxu0 %vm355_vm0, %v300_v3  ;;  %v309_v6 = vld [vmem:[%s266_s14 + $0x48] sm:$0xff]  ;;  %v310_v8 = vld [vmem:[%s266_s14 + $0x50] sm:$0xff] }
  0x1b   : > { %3005 = vmatprep.mubr.msk.f32.mxu1 %vm355_vm0, %v308_v4  ;;  %2994 = vmatmul.mubr.msk.f32.vlgmr.msra.gmra.mrb[0].mxu0 %vm355_vm0, %v301_v5  ;;  %v303_v9 = vld [vmem:[%s266_s14 + $0x18] sm:$0xff]  ;;  %v304_v11 = vld [vmem:[%s266_s14 + $0x20] sm:$0xff]  ;;  %v305_v13 = vld [vmem:[%s266_s14 + $0x28] sm:$0xff] }
  0x1c   : > { %3006 = vmatmul.mubr.msk.f32.vlgmr.msra.gmra.mrb[0].mxu1 %vm355_vm0, %v309_v6  ;;  %2996 = vmatprep.mubr.msk.f32.mxu0 %vm355_vm0, %v302_v7  ;;  %v311_v10 = vld [vmem:[%s266_s14 + $0x58] sm:$0xff]  ;;  %v312_v12 = vld [vmem:[%s266_s14 + $0x60] sm:$0xff]  ;;  %v313_v14 = vld [vmem:[%s266_s14 + $0x68] sm:$0xff] }
  0x1d   : > { %3008 = vmatprep.mubr.msk.f32.mxu1 %vm355_vm0, %v310_v8  ;;  %v306_v15 = vld [vmem:[%s266_s14 + $0x30] sm:$0xff]  ;;  %v307_v17 = vld [vmem:[%s266_s14 + $0x38] sm:$0xff]  ;;  %3268 = vmatpush3.bf16.msra.mxu1 %v3265_v21 }
  0x1e   : > { %v314_v16 = vld [vmem:[%s266_s14 + $0x70] sm:$0xff]  ;;  %v315_v18 = vld [vmem:[%s266_s14 + $0x78] sm:$0xff]  ;;  %3270 = vmatprep.subr.bf16.mxu1 %v3269_v24 }
  0x1f   : > { %2997 = vmatmul.mubr.msk.f32.gmra.mrb[2].mxu0 %vm355_vm0, %v303_v9 }
  0x20   : > { %3009 = vmatmul.mubr.msk.f32.gmra.mrb[2].mxu1 %vm355_vm0, %v311_v10  ;;  %2999 = vmatprep.mubr.msk.f32.mxu0 %vm355_vm0, %v304_v11 }
  0x21   : > { %3011 = vmatprep.mubr.msk.f32.mxu1 %vm355_vm0, %v312_v12  ;;  %3272 = vmatpush3.bf16.msra.mxu1 %v3269_v24 }
  0x22   : > { %3049 = vmatprep.subr.msk.mxu1 %vm936_vm1, %v3749_v25 }
  0x23   : > { %3000 = vmatmul.mubr.msk.f32.gmra.mrb[4].mxu0 %vm355_vm0, %v305_v13 }
  0x24   : > { %3012 = vmatmul.mubr.msk.f32.gmra.mrb[4].mxu1 %vm355_vm0, %v313_v14  ;;  %3002 = vmatprep.mubr.msk.f32.mxu0 %vm355_vm0, %v306_v15 }
  0x25   : > { %3014 = vmatprep.mubr.msk.f32.mxu1 %vm355_vm0, %v314_v16 }
  0x27   : > { %3003 = vmatmul.mubr.msk.f32.gmra.mrb[6].mxu0 %vm355_vm0, %v307_v17 }
  0x28   : > { %3015 = vmatmul.mubr.msk.f32.gmra.mrb[6].mxu1 %vm355_vm0, %v315_v18 }
  0xee   : > { %v2995_v27 = vpop.f32.mrb[0].mxu0 }
  0xef   : > { %v3007_v28 = vpop.f32.mrb[0].mxu1  ;;  %v3759_v29 = vadd.f32 %v2995_v27, %v3756_v26  ;;  %v470_v30 = vpop.f32.mrb[1].mxu0 }
  0xf0   : > { %v510_v31 = vpop.f32.mrb[1].mxu1  ;;  %v3762_v32 = vadd.f32 %v3756_v26, %v470_v30  ;;  %v3770_v40 = vadd.f32 %v3007_v28, %v3756_v26 }
  0xf1   : > { %v566_v33 = vmul.f32 0.044715, %v3759_v29  ;;  %v3778_v44 = vadd.f32 %v3756_v26, %v510_v31 }
  0xf2   : > { %v2998_v34 = vpop.f32.mrb[2].mxu0  ;;  %v565_v41 = vmul.f32 0.044715, %v3762_v32  ;;  %v574_v51 = vmul.f32 0.044715, %v3770_v40 }
  0xf3   : > { %v3010_v35 = vpop.f32.mrb[2].mxu1  ;;  %v582_v36 = vmul.f32 %v566_v33, %v3759_v29  ;;  %v3767_v37 = vadd.f32 %v2998_v34, %v3756_v26  ;;  %v480_v38 = vpop.f32.mrb[3].mxu0  ;;  %v573_v56 = vmul.f32 0.044715, %v3778_v44 }
  0xf4   : > { %v520_v39 = vpop.f32.mrb[3].mxu1  ;;  %v3774_v42 = vadd.f32 %v3756_v26, %v480_v38  ;;  %v581_v52 = vmul.f32 %v565_v41, %v3762_v32  ;;  %v3791_v57 = vadd.f32 %v3010_v35, %v3756_v26  ;;  %v590_v2 = vmul.f32 %v574_v51, %v3770_v40 }
  0xf5   : > { %v598_v43 = vmul.f32 %v582_v36, %v3759_v29  ;;  %v568_v48 = vmul.f32 0.044715, %v3767_v37  ;;  %v3798_v62 = vadd.f32 %v3756_v26, %v520_v39  ;;  %v589_v9 = vmul.f32 %v573_v56, %v3778_v44 }
  0xf6   : > { %v567_v45 = vmul.f32 0.044715, %v3774_v42  ;;  %v3001_v46 = vpop.f32.mrb[4].mxu0  ;;  %v597_v3 = vmul.f32 %v581_v52, %v3762_v32  ;;  %v576_v10 = vmul.f32 0.044715, %v3791_v57  ;;  %v606_v41 = vmul.f32 %v590_v2, %v3770_v40 }
  0xf7   : > { %v3013_v47 = vpop.f32.mrb[4].mxu1  ;;  %v490_v49 = vpop.f32.mrb[5].mxu0  ;;  %v614_v53 = vadd.f32 %v598_v43, %v3759_v29  ;;  %v3787_v55 = vadd.f32 %v3001_v46, %v3756_v26  ;;  %v584_v61 = vmul.f32 %v568_v48, %v3767_v37  ;;  %v575_v14 = vmul.f32 0.044715, %v3798_v62 }
  0xf8   : > { %v530_v50 = vpop.f32.mrb[5].mxu1  ;;  %v583_v54 = vmul.f32 %v567_v45, %v3774_v42  ;;  %v3794_v58 = vadd.f32 %v3756_v26, %v490_v49  ;;  %v613_v17 = vadd.f32 %v597_v3, %v3762_v32  ;;  %v3827_v22 = vadd.f32 %v3013_v47, %v3756_v26 }
  0xf9   : > { %v570_v63 = vmul.f32 0.044715, %v3787_v55  ;;  %v630_v5 = vmul.f32 0.7978846, %v614_v53  ;;  %v600_v13 = vmul.f32 %v584_v61, %v3767_v37  ;;  %v3818_v15 = vadd.f32 %v3756_v26, %v530_v50 }
  0xfa   : > { %v3004_v59 = vpop.f32.mrb[6].mxu0  ;;  %v569_v4 = vmul.f32 0.044715, %v3794_v58  ;;  %v599_v6 = vmul.f32 %v583_v54, %v3774_v42  ;;  %v605_v24 = vmul.f32 %v589_v9, %v3778_v44  ;;  %v591_v31 = vmul.f32 %v575_v14, %v3798_v62  ;;  %v332_v9 = vld [vmem:[%s4677_s4 + $0x8] sm:$0xff]  ;;  %v326_v14 = vld [vmem:[%s4676_s3 + $0x50] sm:$0xff] }
  0xfb   : > { %v3016_v60 = vpop.f32.mrb[6].mxu1  ;;  %v500_v0 = vpop.f32.mrb[7].mxu0  ;;  %v586_v7 = vmul.f32 %v570_v63, %v3787_v55  ;;  %v3807_v8 = vadd.f32 %v3004_v59, %v3756_v26  ;;  %3386 = vtanh.f32 %v630_v5  ;;  %v616_v30 = vadd.f32 %v600_v13, %v3767_v37 }
  0xfc   : > { %v540_v1 = vpop.f32.mrb[7].mxu1  ;;  %v585_v11 = vmul.f32 %v569_v4, %v3794_v58  ;;  %v3813_v12 = vadd.f32 %v3756_v26, %v500_v0  ;;  %v615_v21 = vadd.f32 %v599_v6, %v3774_v42  ;;  %v577_v33 = vmul.f32 0.044715, %v3818_v15  ;;  %v331_v4 = vld [vmem:[%s4677_s4] sm:$0xff] }
  0xfd   : > { %v572_v16 = vmul.f32 0.044715, %v3807_v8  ;;  %v602_v18 = vmul.f32 %v586_v7, %v3787_v55  ;;  %v3833_v28 = vadd.f32 %v3756_v26, %v540_v1  ;;  %v629_v39 = vmul.f32 0.7978846, %v613_v17 }
  0xfe   : > { %v601_v19 = vmul.f32 %v585_v11, %v3794_v58  ;;  %v571_v20 = vmul.f32 0.044715, %v3813_v12  ;;  %v592_v43 = vmul.f32 %v576_v10, %v3791_v57  ;;  %v578_v45 = vmul.f32 0.044715, %v3827_v22  ;;  %v333_v10 = vld [vmem:[%s4677_s4 + $0x10] sm:$0xff]  ;;  %v334_v11 = vld [vmem:[%s4677_s4 + $0x18] sm:$0xff] }
  0xff   : > { %v588_v23 = vmul.f32 %v572_v16, %v3807_v8  ;;  %v618_v35 = vadd.f32 %v602_v18, %v3787_v55  ;;  %v631_v46 = vmul.f32 0.7978846, %v615_v21  ;;  %v3846_v47 = vadd.f32 %v3016_v60, %v3756_v26  ;;  %v327_v16 = vld [vmem:[%s4676_s3 + $0x58] sm:$0xff] }
 0x100   : > { %v587_v27 = vmul.f32 %v571_v20, %v3813_v12  ;;  %v617_v36 = vadd.f32 %v601_v19, %v3794_v58  ;;  %v579_v49 = vmul.f32 0.044715, %v3833_v28  ;;  %3388 = vtanh.f32 %v629_v39 }
 0x101   : > { %v604_v34 = vmul.f32 %v588_v23, %v3807_v8  ;;  %v621_v50 = vadd.f32 %v605_v24, %v3778_v44  ;;  %3390 = vtanh.f32 %v631_v46  ;;  %v632_v52 = vmul.f32 0.7978846, %v616_v30 }
 0x102   : > { %v603_v38 = vmul.f32 %v587_v27, %v3813_v12  ;;  %v607_v53 = vmul.f32 %v591_v31, %v3798_v62  ;;  %v593_v54 = vmul.f32 %v577_v33, %v3818_v15  ;;  %v633_v56 = vmul.f32 0.7978846, %v617_v36 }
 0x103   : > { %v620_v51 = vadd.f32 %v604_v34, %v3807_v8  ;;  %v634_v59 = vmul.f32 0.7978846, %v618_v35  ;;  %v594_v26 = vmul.f32 %v578_v45, %v3827_v22  ;;  %3392 = vtanh.f32 %v632_v52 }
 0x104   : > { %v619_v48 = vadd.f32 %v603_v38, %v3813_v12  ;;  %v608_v61 = vmul.f32 %v592_v43, %v3791_v57  ;;  %v580_v63 = vmul.f32 0.044715, %v3846_v47  ;;  %v595_v0 = vmul.f32 %v579_v49, %v3833_v28 }
 0x105   : > { %3394 = vtanh.f32 %v633_v56  ;;  %v3387_v1 = vpop.eup %3386  ;;  %v622_v2 = vadd.f32 %v606_v41, %v3770_v40  ;;  %v636_v3 = vmul.f32 0.7978846, %v620_v51  ;;  %v623_v5 = vadd.f32 %v607_v53, %v3798_v62 }
 0x106   : > { %v635_v60 = vmul.f32 0.7978846, %v619_v48  ;;  %3396 = vtanh.f32 %v634_v59  ;;  %v609_v6 = vmul.f32 %v593_v54, %v3818_v15  ;;  %v637_v7 = vmul.f32 0.7978846, %v621_v50 }
 0x107   : > { %v610_v13 = vmul.f32 %v594_v26, %v3827_v22  ;;  %v662_v17 = vadd.f32 1.0, %v3387_v1  ;;  %v624_v18 = vadd.f32 %v608_v61, %v3791_v57  ;;  %v596_v19 = vmul.f32 %v580_v63, %v3846_v47 }
 0x108   : > { %3398 = vtanh.f32 %v635_v60  ;;  %v611_v20 = vmul.f32 %v595_v0, %v3833_v28  ;;  %v638_v21 = vmul.f32 0.7978846, %v622_v2  ;;  %v3273_v23 = vpack.c.bf16 %v332_v9, %v331_v4 }
 0x109   : > { %3400 = vtanh.f32 %v636_v3  ;;  %v3277_v24 = vpack.c.bf16 %v334_v11, %v333_v10  ;;  %v625_v30 = vadd.f32 %v609_v6, %v3818_v15  ;;  %v639_v31 = vmul.f32 0.7978846, %v623_v5 }
 0x10a   : > { %v3389_v27 = vpop.eup %3388  ;;  %3402 = vtanh.f32 %v637_v7  ;;  %v3884_v33 = vpack.c.bf16 %v327_v16, %v326_v14  ;;  %v550_v35 = vmul.f32 0.5, %v3759_v29  ;;  %v626_v36 = vadd.f32 %v610_v13, %v3827_v22  ;;  %3274 = vmatprep.subr.bf16.mxu0 %v3273_v23 }
 0x10b   : > { %v3391_v34 = vpop.eup %3390  ;;  %v549_v38 = vmul.f32 0.5, %v3762_v32  ;;  %v661_v39 = vadd.f32 1.0, %v3389_v27  ;;  %v612_v41 = vmul.f32 %v596_v19, %v3846_v47  ;;  %v627_v43 = vadd.f32 %v611_v20, %v3833_v28  ;;  %3276 = vmatpush3.bf16.msra.mxu0 %v3273_v23 }
 0x10c   : > { %v551_v45 = vmul.f32 0.5, %v3774_v42  ;;  %v663_v46 = vadd.f32 1.0, %v3391_v34  ;;  %v3892_v49 = vmul.f32 %v662_v17, %v550_v35  ;;  %3404 = vtanh.f32 %v638_v21  ;;  %3278 = vmatprep.subr.bf16.mxu0 %v3277_v24 }
 0x10d   : > { %v3393_v48 = vpop.eup %3392  ;;  %v3894_v50 = vmul.f32 %v661_v39, %v549_v38  ;;  %v640_v29 = vmul.f32 0.7978846, %v624_v18  ;;  %3406 = vtanh.f32 %v639_v31  ;;  %v641_v53 = vmul.f32 0.7978846, %v625_v30 }
 0x10e   : > { %v3896_v32 = vmul.f32 %v663_v46, %v551_v45  ;;  %v664_v52 = vadd.f32 1.0, %v3393_v48  ;;  %v553_v42 = vmul.f32 0.5, %v3794_v58  ;;  %v628_v26 = vadd.f32 %v612_v41, %v3846_v47  ;;  %v268_v46 = vld [vmem:[%s3964_s10] sm:$0xff] }
 0x10f   : > { %v3395_v51 = vpop.eup %3394  ;;  %3025 = vmatprep.mubr.msk.f32.mxu1 %vm693_vm2, %v3894_v50  ;;  %v552_v60 = vmul.f32 0.5, %v3767_v37  ;;  %3280 = vmatpush3.bf16.msra.mxu0 %v3277_v24  ;;  %3408 = vtanh.f32 %v640_v29  ;;  %v642_v58 = vmul.f32 0.7978846, %v626_v36  ;;  %v643_v2 = vmul.f32 0.7978846, %v627_v43  ;;  %v328_v48 = vld [vmem:[%s4676_s3 + $0x60] sm:$0xff] }
 0x110   : > { %v3397_v54 = vpop.eup %3396  ;;  %v665_v56 = vadd.f32 1.0, %v3395_v51  ;;  %3026 = vmatmul.mubr.msk.f32.vlgmr.msra.gmra.mrb[8].mxu1 %vm693_vm2, %v3892_v49  ;;  %3410 = vtanh.f32 %v641_v53  ;;  %v555_v3 = vmul.f32 0.5, %v3813_v12  ;;  %v644_v6 = vmul.f32 0.7978846, %v628_v26  ;;  %v329_v29 = vld [vmem:[%s4676_s3 + $0x68] sm:$0xff]  ;;  %v270_v51 = vld [vmem:[%s3964_s10 + $0x10] sm:$0xff] }
 0x111   : > { %3050 = vmatpush3.msk.msra.mxu1 %vm936_vm1, %v3749_v25  ;;  %3028 = vmatprep.mubr.msk.f32.mxu1 %vm693_vm2, %v3896_v32  ;;  %v3911_v0 = vmul.f32 %v664_v52, %v552_v60  ;;  %v666_v1 = vadd.f32 1.0, %v3397_v54  ;;  %v554_v25 = vmul.f32 0.5, %v3787_v55  ;;  %3412 = vtanh.f32 %v642_v58  ;;  %v271_v53 = vld [vmem:[%s3964_s10 + $0x18] sm:$0xff]  ;;  %v272_v54 = vld [vmem:[%s3964_s10 + $0x20] sm:$0xff]  ;;  %v277_v26 = vld [vmem:[%s3964_s10 + $0x48] sm:$0xff] }
 0x112   : > { %v3399_v59 = vpop.eup %3398  ;;  %v3909_v61 = vmul.f32 %v665_v56, %v553_v42  ;;  %3290 = vmatprep.subr.bf16.mxu1 %v3884_v33  ;;  %3414 = vtanh.f32 %v643_v2  ;;  %v556_v13 = vmul.f32 0.5, %v3807_v8  ;;  %v557_v55 = vmul.f32 0.5, %v3778_v44  ;;  %v273_v42 = vld [vmem:[%s3964_s10 + $0x28] sm:$0xff]  ;;  %v274_v56 = vld [vmem:[%s3964_s10 + $0x30] sm:$0xff]  ;;  %v280_v58 = vld [vmem:[%s3964_s10 + $0x60] sm:$0xff] }
 0x113   : > { %v667_v63 = vadd.f32 1.0, %v3399_v59  ;;  %v3401_v37 = vpop.eup %3400  ;;  %v3922_v7 = vmul.f32 %v666_v1, %v554_v25  ;;  %3416 = vtanh.f32 %v644_v6  ;;  %v558_v21 = vmul.f32 0.5, %v3770_v40  ;;  %v275_v59 = vld [vmem:[%s3964_s10 + $0x38] sm:$0xff]  ;;  %v278_v60 = vld [vmem:[%s3964_s10 + $0x50] sm:$0xff]  ;;  %v281_v1 = vld [vmem:[%s3964_s10 + $0x68] sm:$0xff] }
 0x114   : > { %v3403_v4 = vpop.eup %3402  ;;  %3029 = vmatmul.mubr.msk.f32.gmra.mrb[10].mxu1 %vm693_vm2, %v3911_v0  ;;  %v668_v9 = vadd.f32 1.0, %v3401_v37  ;;  %v559_v8 = vmul.f32 0.5, %v3798_v62  ;;  %v560_v34 = vmul.f32 0.5, %v3791_v57  ;;  %v561_v40 = vmul.f32 0.5, %v3818_v15  ;;  %v282_v2 = vld [vmem:[%s3964_s10 + $0x70] sm:$0xff]  ;;  %v283_v37 = vld [vmem:[%s3964_s10 + $0x78] sm:$0xff] }
 0x115   : > { %3031 = vmatprep.mubr.msk.f32.mxu1 %vm693_vm2, %v3909_v61  ;;  %v3920_v5 = vmul.f32 %v667_v63, %v555_v3  ;;  %v669_v11 = vadd.f32 1.0, %v3403_v4  ;;  %v562_v41 = vmul.f32 0.5, %v3827_v22  ;;  %v563_v57 = vmul.f32 0.5, %v3833_v28  ;;  %v279_v63 = vld [vmem:[%s3964_s10 + $0x58] sm:$0xff] }
 0x116   : > { %v3405_v10 = vpop.eup %3404  ;;  %v3930_v14 = vmul.f32 %v668_v9, %v556_v13  ;;  %v564_v22 = vmul.f32 0.5, %v3846_v47  ;;  %v269_v47 = vld [vmem:[%s3964_s10 + $0x8] sm:$0xff]  ;;  %v3293_v52 = vpack.c.bf16 %v329_v29, %v328_v48  ;;  %v338_v6 = vld [vmem:[%s4677_s4 + $0x38] sm:$0xff] }
 0x117   : > { %v3407_v12 = vpop.eup %3406  ;;  %v670_v16 = vadd.f32 1.0, %v3405_v10  ;;  %v3932_v18 = vmul.f32 %v669_v11, %v557_v55 }
 0x118   : > { %3032 = vmatmul.mubr.msk.f32.gmra.mrb[12].mxu1 %vm693_vm2, %v3922_v7  ;;  %v671_v19 = vadd.f32 1.0, %v3407_v12 }
 0x119   : > { %3034 = vmatprep.mubr.msk.f32.mxu1 %vm693_vm2, %v3920_v5  ;;  %v3409_v17 = vpop.eup %3408  ;;  %v3940_v44 = vmul.f32 %v670_v16, %v558_v21 }
 0x11a   : > { %v3411_v20 = vpop.eup %3410  ;;  %v672_v23 = vadd.f32 1.0, %v3409_v17  ;;  %v3942_v27 = vmul.f32 %v671_v19, %v559_v8 }
 0x11b   : > { %v3413_v24 = vpop.eup %3412  ;;  %v673_v30 = vadd.f32 1.0, %v3411_v20 }
 0x11c   : > { %3035 = vmatmul.mubr.msk.f32.gmra.mrb[14].mxu1 %vm693_vm2, %v3930_v14  ;;  %v3415_v31 = vpop.eup %3414  ;;  %v3950_v62 = vmul.f32 %v672_v23, %v560_v34  ;;  %v674_v35 = vadd.f32 1.0, %v3413_v24 }
 0x11d   : > { %3037 = vmatprep.mubr.msk.f32.mxu1 %vm693_vm2, %v3932_v18  ;;  %v3417_v36 = vpop.eup %3416  ;;  %v3952_v38 = vmul.f32 %v673_v30, %v561_v40  ;;  %v675_v39 = vadd.f32 1.0, %v3415_v31 }
 0x11e   : > { %v690_v43 = vmul.f32 %v674_v35, %v562_v41  ;;  %v676_v45 = vadd.f32 1.0, %v3417_v36 }
 0x11f   : > { %v691_v15 = vmul.f32 %v675_v39, %v563_v57 }
 0x120   : > { %3038 = vmatmul.mubr.msk.f32.gmra.mrb[16].mxu1 %vm693_vm2, %v3940_v44  ;;  %v692_v28 = vmul.f32 %v676_v45, %v564_v22 }
 0x121   : > { %3040 = vmatprep.mubr.msk.f32.mxu1 %vm693_vm2, %v3942_v27 }
 0x124   : > { %3041 = vmatmul.mubr.msk.f32.gmra.mrb[18].mxu1 %vm693_vm2, %v3950_v62 }
 0x125   : > { %3043 = vmatprep.mubr.msk.f32.mxu1 %vm693_vm2, %v3952_v38 }
 0x128   : > { %3044 = vmatmul.mubr.msk.f32.gmra.mrb[20].mxu1 %vm693_vm2, %v690_v43 }
 0x129   : > { %3046 = vmatprep.mubr.msk.f32.mxu1 %vm693_vm2, %v691_v15 }
 0x12c   : > { %3047 = vmatmul.mubr.msk.f32.gmra.mrb[22].mxu1 %vm693_vm2, %v692_v28 }
 0x12d   : > { %3051 = vmatprep.mubr.msk.f32.mxu1 %vm887_vm3, %v268_v46 }
 0x130   : > { %3052 = vmatmul.mubr.msk.f32.vlgmr.msra.gmra.mrb[8].mxu1 %vm887_vm3, %v269_v47 }
 0x131   : > { %3054 = vmatprep.mubr.msk.f32.mxu1 %vm887_vm3, %v270_v51  ;;  %3292 = vmatpush3.bf16.msra.mxu1 %v3884_v33  ;;  %v276_v33 = vld [vmem:[%s3964_s10 + $0x40] sm:$0xff] }
 0x132   : > { %3294 = vmatprep.subr.bf16.mxu1 %v3293_v52 }
 0x134   : > { %3055 = vmatmul.mubr.msk.f32.gmra.mrb[10].mxu1 %vm887_vm3, %v271_v53 }
 0x135   : > { %3057 = vmatprep.mubr.msk.f32.mxu1 %vm887_vm3, %v272_v54  ;;  %3296 = vmatpush3.bf16.msra.mxu1 %v3293_v52 }
 0x138   : > { %3058 = vmatmul.mubr.msk.f32.gmra.mrb[12].mxu1 %vm887_vm3, %v273_v42 }
 0x139   : > { %3060 = vmatprep.mubr.msk.f32.mxu1 %vm887_vm3, %v274_v56 }
 0x13c   : > { %3061 = vmatmul.mubr.msk.f32.gmra.mrb[14].mxu1 %vm887_vm3, %v275_v59  ;;  %v325_v59 = vld [vmem:[%s4676_s3 + $0x48] sm:$0x3] }
 0x13d   : > { %3063 = vmatprep.mubr.msk.f32.mxu1 %vm887_vm3, %v276_v33  ;;  %3171 = vmatprep.subr.msk.mxu1 %vm936_vm1, %v325_v59  ;;  %v339_v33 = vld [vmem:[%s4677_s4 + $0x40] sm:$0xff] }
 0x140   : > { %3064 = vmatmul.mubr.msk.f32.gmra.mrb[16].mxu1 %vm887_vm3, %v277_v26  ;;  %v340_v26 = vld [vmem:[%s4677_s4 + $0x48] sm:$0xff] }
 0x141   : > { %3066 = vmatprep.mubr.msk.f32.mxu1 %vm887_vm3, %v278_v60  ;;  %v341_v60 = vld [vmem:[%s4677_s4 + $0x50] sm:$0xff] }
 0x144   : > { %3067 = vmatmul.mubr.msk.f32.gmra.mrb[18].mxu1 %vm887_vm3, %v279_v63  ;;  %v3297_v63 = vpack.c.bf16 %v340_v26, %v339_v33 }
 0x145   : > { %3069 = vmatprep.mubr.msk.f32.mxu1 %vm887_vm3, %v280_v58  ;;  %v342_v58 = vld [vmem:[%s4677_s4 + $0x58] sm:$0xff] }
 0x148   : > { %3070 = vmatmul.mubr.msk.f32.gmra.mrb[20].mxu1 %vm887_vm3, %v281_v1  ;;  %v3301_v1 = vpack.c.bf16 %v342_v58, %v341_v60 }
 0x149   : > { %3072 = vmatprep.mubr.msk.f32.mxu1 %vm887_vm3, %v282_v2  ;;  %v4140_v2 = vld [vmem:[%s4677_s4 + $0x80] ss:$0 sm:$0xff] }
 0x14c   : > { %3073 = vmatmul.mubr.msk.f32.gmra.mrb[22].mxu1 %vm887_vm3, %v283_v37 }
 0x14d   : > { %3147 = vmatprep.mubr.msk.f32.mxu1 %vm693_vm2, %v3894_v50  ;;  %v336_v50 = vld [vmem:[%s4677_s4 + $0x28] sm:$0xff] }
 0x150   : > { %3148 = vmatmul.mubr.msk.f32.vlgmr.msra.gmra.mrb[24].mxu1 %vm693_vm2, %v3892_v49  ;;  %v335_v49 = vld [vmem:[%s4677_s4 + $0x20] sm:$0xff] }
 0x151   : > { %3150 = vmatprep.mubr.msk.f32.mxu1 %vm693_vm2, %v3896_v32  ;;  %v3281_v32 = vpack.c.bf16 %v336_v50, %v335_v49  ;;  %3172 = vmatpush3.msk.msra.mxu1 %vm936_vm1, %v325_v59 }
 0x153   : > { %3282 = vmatprep.subr.bf16.mxu0 %v3281_v32 }
 0x154   : > { %3151 = vmatmul.mubr.msk.f32.gmra.mrb[26].mxu1 %vm693_vm2, %v3911_v0 }
 0x155   : > { %3153 = vmatprep.mubr.msk.f32.mxu1 %vm693_vm2, %v3909_v61  ;;  %v4047_v61 = vld [vmem:[%s4676_s3 + $0x40] ss:$0 sm:$0xff] }
 0x158   : > { %3154 = vmatmul.mubr.msk.f32.gmra.mrb[28].mxu1 %vm693_vm2, %v3922_v7 }
 0x159   : > { %3156 = vmatprep.mubr.msk.f32.mxu1 %vm693_vm2, %v3920_v5  ;;  %v337_v5 = vld [vmem:[%s4677_s4 + $0x30] sm:$0xff] }
 0x15a   : > { %v3285_v13 = vpack.c.bf16 %v338_v6, %v337_v5 }
 0x15c   : > { %3157 = vmatmul.mubr.msk.f32.gmra.mrb[30].mxu1 %vm693_vm2, %v3930_v14 }
 0x15d   : > { %3159 = vmatprep.mubr.msk.f32.mxu1 %vm693_vm2, %v3932_v18 }
 0x160   : > { %3160 = vmatmul.mubr.msk.f32.gmra.mrb[32].mxu1 %vm693_vm2, %v3940_v44 }
 0x161   : > { %3162 = vmatprep.mubr.msk.f32.mxu1 %vm693_vm2, %v3942_v27 }
 0x164   : > { %3163 = vmatmul.mubr.msk.f32.gmra.mrb[34].mxu1 %vm693_vm2, %v3950_v62 }
 0x165   : > { %3165 = vmatprep.mubr.msk.f32.mxu1 %vm693_vm2, %v3952_v38 }
 0x168   : > { %3166 = vmatmul.mubr.msk.f32.gmra.mrb[36].mxu1 %vm693_vm2, %v690_v43 }
 0x169   : > { %3168 = vmatprep.mubr.msk.f32.mxu1 %vm693_vm2, %v691_v15 }
 0x16c   : > { %3169 = vmatmul.mubr.msk.f32.gmra.mrb[38].mxu1 %vm693_vm2, %v692_v28 }
 0x203   : > { %v3053_v0 = vpop.f32.mrb[8].mxu1 }
 0x204   : > { %v4050_v3 = vadd.f32 %v3053_v0, %v4047_v61  ;;  %v1006_v4 = vpop.f32.mrb[9].mxu1 }
 0x205   : > { %v4053_v25 = vadd.f32 %v4047_v61, %v1006_v4 }
 0x206   : > { %v1106_v10 = vmax.f32 %v4050_v3, 0.0 }
 0x207   : > { %v1105_v7 = vmax.f32 %v4053_v25, 0.0  ;;  %v3056_v9 = vpop.f32.mrb[10].mxu1 }
 0x208   : > { %v4064_v11 = vadd.f32 %v3056_v9, %v4047_v61  ;;  %v1016_v12 = vpop.f32.mrb[11].mxu1 }
 0x209   : > { %v1091_v55 = vadd.f32 %v4047_v61, %v1016_v12  ;;  %3083 = vmatprep.mubr.msk.f32.mxu0 %vm693_vm2, %v1105_v7 }
 0x20a   : > { %3084 = vmatmul.mubr.msk.f32.vlgmr.msra.gmra.mrb[8].mxu0 %vm693_vm2, %v1106_v10  ;;  %v1108_v17 = vmax.f32 %v4064_v11, 0.0 }
 0x20b   : > { %v1107_v14 = vmax.f32 %v1091_v55, 0.0  ;;  %3284 = vmatpush3.bf16.msra.mxu0 %v3281_v32  ;;  %v3059_v16 = vpop.f32.mrb[12].mxu1 }
 0x20c   : > { %v1094_v18 = vadd.f32 %v3059_v16, %v4047_v61  ;;  %v1026_v19 = vpop.f32.mrb[13].mxu1  ;;  %3286 = vmatprep.subr.bf16.mxu0 %v3285_v13 }
 0x20d   : > { %v1093_v20 = vadd.f32 %v4047_v61, %v1026_v19  ;;  %3086 = vmatprep.mubr.msk.f32.mxu0 %vm693_vm2, %v1107_v14 }
 0x20e   : > { %3087 = vmatmul.mubr.msk.f32.gmra.mrb[10].mxu0 %vm693_vm2, %v1108_v17  ;;  %v1110_v44 = vmax.f32 %v1094_v18, 0.0 }
 0x20f   : > { %v1109_v21 = vmax.f32 %v1093_v20, 0.0  ;;  %v3062_v8 = vpop.f32.mrb[14].mxu1  ;;  %3288 = vmatpush3.bf16.msra.mxu0 %v3285_v13 }
 0x210   : > { %v1096_v23 = vadd.f32 %v3062_v8, %v4047_v61  ;;  %v1036_v24 = vpop.f32.mrb[15].mxu1  ;;  %3298 = vmatprep.subr.bf16.mxu0 %v3297_v63 }
 0x211   : > { %v1095_v27 = vadd.f32 %v4047_v61, %v1036_v24  ;;  %3089 = vmatprep.mubr.msk.f32.mxu0 %vm693_vm2, %v1109_v21 }
 0x212   : > { %3090 = vmatmul.mubr.msk.f32.gmra.mrb[12].mxu0 %vm693_vm2, %v1110_v44  ;;  %v1112_v34 = vmax.f32 %v1096_v23, 0.0 }
 0x213   : > { %v1111_v30 = vmax.f32 %v1095_v27, 0.0  ;;  %v3065_v31 = vpop.f32.mrb[16].mxu1 }
 0x214   : > { %v1098_v40 = vadd.f32 %v3065_v31, %v4047_v61  ;;  %v1046_v62 = vpop.f32.mrb[17].mxu1 }
 0x215   : > { %v1097_v35 = vadd.f32 %v4047_v61, %v1046_v62  ;;  %3092 = vmatprep.mubr.msk.f32.mxu0 %vm693_vm2, %v1111_v30 }
 0x216   : > { %3093 = vmatmul.mubr.msk.f32.gmra.mrb[14].mxu0 %vm693_vm2, %v1112_v34  ;;  %v1114_v39 = vmax.f32 %v1098_v40, 0.0 }
 0x217   : > { %v1113_v36 = vmax.f32 %v1097_v35, 0.0  ;;  %v3068_v38 = vpop.f32.mrb[18].mxu1 }
 0x218   : > { %v1100_v41 = vadd.f32 %v3068_v38, %v4047_v61  ;;  %v1056_v57 = vpop.f32.mrb[19].mxu1 }
 0x219   : > { %v1099_v43 = vadd.f32 %v4047_v61, %v1056_v57  ;;  %3095 = vmatprep.mubr.msk.f32.mxu0 %vm693_vm2, %v1113_v36 }
 0x21a   : > { %3096 = vmatmul.mubr.msk.f32.gmra.mrb[16].mxu0 %vm693_vm2, %v1114_v39  ;;  %v1116_v22 = vmax.f32 %v1100_v41, 0.0 }
 0x21b   : > { %v1115_v45 = vmax.f32 %v1099_v43, 0.0  ;;  %v3071_v15 = vpop.f32.mrb[20].mxu1 }
 0x21c   : > { %v1102_v28 = vadd.f32 %v3071_v15, %v4047_v61  ;;  %v1066_v46 = vpop.f32.mrb[21].mxu1 }
 0x21d   : > { %v1101_v48 = vadd.f32 %v4047_v61, %v1066_v46  ;;  %3098 = vmatprep.mubr.msk.f32.mxu0 %vm693_vm2, %v1115_v45 }
 0x21e   : > { %3099 = vmatmul.mubr.msk.f32.gmra.mrb[18].mxu0 %vm693_vm2, %v1116_v22  ;;  %v1118_v51 = vmax.f32 %v1102_v28, 0.0 }
 0x21f   : > { %v1117_v29 = vmax.f32 %v1101_v48, 0.0  ;;  %v3074_v47 = vpop.f32.mrb[22].mxu1 }
 0x220   : > { %v1104_v52 = vadd.f32 %v3074_v47, %v4047_v61  ;;  %v1076_v53 = vpop.f32.mrb[23].mxu1 }
 0x221   : > { %v1103_v54 = vadd.f32 %v4047_v61, %v1076_v53  ;;  %3101 = vmatprep.mubr.msk.f32.mxu0 %vm693_vm2, %v1117_v29  ;;  %v284_v53 = vld [vmem:[%s4183_s12] sm:$0xff] }
 0x222   : > { %3102 = vmatmul.mubr.msk.f32.gmra.mrb[20].mxu0 %vm693_vm2, %v1118_v51  ;;  %v1120_v56 = vmax.f32 %v1104_v52, 0.0 }
 0x223   : > { %v1119_v42 = vmax.f32 %v1103_v54, 0.0 }
 0x225   : > { %3104 = vmatprep.mubr.msk.f32.mxu0 %vm693_vm2, %v1119_v42 }
 0x226   : > { %3105 = vmatmul.mubr.msk.f32.gmra.mrb[22].mxu0 %vm693_vm2, %v1120_v56 }
 0x227   : > { %3115 = vmatprep.mubr.msk.f32.mxu0 %vm693_vm2, %v1105_v7 }
 0x22a   : > { %3116 = vmatmul.mubr.msk.f32.vlgmr.msra.gmra.mrb[24].mxu0 %vm693_vm2, %v1106_v10 }
 0x22b   : > { %3118 = vmatprep.mubr.msk.f32.mxu0 %vm693_vm2, %v1107_v14  ;;  %3300 = vmatpush3.bf16.msra.mxu0 %v3297_v63 }
 0x22c   : > { %3302 = vmatprep.subr.bf16.mxu0 %v3301_v1 }
 0x22e   : > { %3119 = vmatmul.mubr.msk.f32.gmra.mrb[26].mxu0 %vm693_vm2, %v1108_v17 }
 0x22f   : > { %3121 = vmatprep.mubr.msk.f32.mxu0 %vm693_vm2, %v1109_v21  ;;  %3304 = vmatpush3.bf16.msra.mxu0 %v3301_v1 }
 0x232   : > { %3122 = vmatmul.mubr.msk.f32.gmra.mrb[28].mxu0 %vm693_vm2, %v1110_v44 }
 0x233   : > { %3124 = vmatprep.mubr.msk.f32.mxu0 %vm693_vm2, %v1111_v30 }
 0x236   : > { %3125 = vmatmul.mubr.msk.f32.gmra.mrb[30].mxu0 %vm693_vm2, %v1112_v34 }
 0x237   : > { %3127 = vmatprep.mubr.msk.f32.mxu0 %vm693_vm2, %v1113_v36 }
 0x23a   : > { %3128 = vmatmul.mubr.msk.f32.gmra.mrb[32].mxu0 %vm693_vm2, %v1114_v39 }
 0x23b   : > { %3130 = vmatprep.mubr.msk.f32.mxu0 %vm693_vm2, %v1115_v45 }
 0x23e   : > { %3131 = vmatmul.mubr.msk.f32.gmra.mrb[34].mxu0 %vm693_vm2, %v1116_v22 }
 0x23f   : > { %3133 = vmatprep.mubr.msk.f32.mxu0 %vm693_vm2, %v1117_v29 }
 0x242   : > { %3134 = vmatmul.mubr.msk.f32.gmra.mrb[36].mxu0 %vm693_vm2, %v1118_v51  ;;  %v4191_v51 = vld [vmem:[%s4677_s4 + $0x88] ss:$0 sm:$0xff] }
 0x243   : > { %3136 = vmatprep.mubr.msk.f32.mxu0 %vm693_vm2, %v1119_v42  ;;  %v285_v42 = vld [vmem:[%s4183_s12 + $0x8] sm:$0xff] }
 0x246   : > { %3137 = vmatmul.mubr.msk.f32.gmra.mrb[38].mxu0 %vm693_vm2, %v1120_v56 }
 0x2dd   : > { %v3085_v37 = vpop.f32.mrb[8].mxu0 }
 0x2de   : > { %v1245_v49 = vadd.f32 %v3085_v37, %v4140_v2  ;;  %v1239_v50 = vpop.f32.mrb[9].mxu0 }
 0x2df   : > { %v1240_v32 = vadd.f32 %v4140_v2, %v1239_v50  ;;  %v286_v50 = vld [vmem:[%s4183_s12 + $0x10] sm:$0xff] }
 0x2e0   : > { %3418 = vtanh.f32 %v1245_v49 }
 0x2e1   : > { %3420 = vtanh.f32 %v1240_v32  ;;  %v3088_v61 = vpop.f32.mrb[10].mxu0 }
 0x2e2   : > { %v1255_v0 = vadd.f32 %v3088_v61, %v4140_v2  ;;  %v1249_v3 = vpop.f32.mrb[11].mxu0 }
 0x2e3   : > { %v1250_v4 = vadd.f32 %v4140_v2, %v1249_v3 }
 0x2e4   : > { %3422 = vtanh.f32 %v1255_v0  ;;  %v287_v0 = vld [vmem:[%s4183_s12 + $0x18] sm:$0xff] }
 0x2e5   : > { %3424 = vtanh.f32 %v1250_v4  ;;  %v3091_v25 = vpop.f32.mrb[12].mxu0 }
 0x2e6   : > { %v1265_v5 = vadd.f32 %v3091_v25, %v4140_v2  ;;  %v1259_v6 = vpop.f32.mrb[13].mxu0 }
 0x2e7   : > { %v1260_v7 = vadd.f32 %v4140_v2, %v1259_v6 }
 0x2e9   : > { %3426 = vtanh.f32 %v1260_v7  ;;  %v3094_v9 = vpop.f32.mrb[14].mxu0 }
 0x2ea   : > { %v4148_v10 = vpop.eup %3418  ;;  %3428 = vtanh.f32 %v1265_v5  ;;  %v1275_v11 = vadd.f32 %v3094_v9, %v4140_v2  ;;  %v1269_v12 = vpop.f32.mrb[15].mxu0 }
 0x2eb   : > { %v4151_v13 = vpop.eup %3420  ;;  %v1270_v55 = vadd.f32 %v4140_v2, %v1269_v12  ;;  %v1485_v14 = vmul.f32 1.442695, %v4148_v10 }
 0x2ec   : > { %3430 = vtanh.f32 %v1275_v11  ;;  %v1483_v16 = vmul.f32 1.442695, %v4151_v13 }
 0x2ed   : > { %v3097_v17 = vpop.f32.mrb[16].mxu0  ;;  %3432 = vtanh.f32 %v1270_v55 }
 0x2ee   : > { %v4156_v18 = vpop.eup %3422  ;;  %v1285_v19 = vadd.f32 %v3097_v17, %v4140_v2  ;;  %v1279_v20 = vpop.f32.mrb[17].mxu0  ;;  %3434 = vpow2.f32 %v1485_v14  ;;  %v288_v17 = vld [vmem:[%s4183_s12 + $0x20] sm:$0xff] }
 0x2ef   : > { %v4159_v21 = vpop.eup %3424  ;;  %v1280_v8 = vadd.f32 %v4140_v2, %v1279_v20  ;;  %v1489_v44 = vmul.f32 1.442695, %v4156_v18  ;;  %3436 = vpow2.f32 %v1483_v16 }
 0x2f0   : > { %v1487_v23 = vmul.f32 1.442695, %v4159_v21  ;;  %3438 = vtanh.f32 %v1285_v19 }
 0x2f1   : > { %v3100_v24 = vpop.f32.mrb[18].mxu0  ;;  %3440 = vtanh.f32 %v1280_v8  ;;  %v289_v8 = vld [vmem:[%s4183_s12 + $0x28] sm:$0xff] }
 0x2f2   : > { %v1295_v27 = vadd.f32 %v3100_v24, %v4140_v2  ;;  %v1289_v30 = vpop.f32.mrb[19].mxu0  ;;  %3442 = vpow2.f32 %v1489_v44 }
 0x2f3   : > { %v4165_v31 = vpop.eup %3426  ;;  %v1290_v34 = vadd.f32 %v4140_v2, %v1289_v30  ;;  %3444 = vpow2.f32 %v1487_v23 }
 0x2f4   : > { %v4168_v40 = vpop.eup %3428  ;;  %v1491_v62 = vmul.f32 1.442695, %v4165_v31  ;;  %3446 = vtanh.f32 %v1295_v27 }
 0x2f5   : > { %v3103_v35 = vpop.f32.mrb[20].mxu0  ;;  %v1493_v41 = vmul.f32 1.442695, %v4168_v40  ;;  %3448 = vtanh.f32 %v1290_v34 }
 0x2f6   : > { %v4171_v36 = vpop.eup %3430  ;;  %v1305_v38 = vadd.f32 %v3103_v35, %v4140_v2  ;;  %v1299_v39 = vpop.f32.mrb[21].mxu0  ;;  %3450 = vpow2.f32 %v1491_v62 }
 0x2f7   : > { %v1300_v57 = vadd.f32 %v4140_v2, %v1299_v39  ;;  %v1497_v43 = vmul.f32 1.442695, %v4171_v36  ;;  %v4177_v45 = vpop.eup %3432 }
 0x2f8   : > { %3452 = vtanh.f32 %v1305_v38  ;;  %v3435_v22 = vpop.eup %3434  ;;  %v1495_v28 = vmul.f32 1.442695, %v4177_v45 }
 0x2f9   : > { %v3106_v15 = vpop.f32.mrb[22].mxu0  ;;  %3454 = vtanh.f32 %v1300_v57  ;;  %v3437_v29 = vpop.eup %3436  ;;  %v1516_v49 = vmul.f32 %v3435_v22, %v285_v42 }
 0x2fa   : > { %v1315_v46 = vadd.f32 %v3106_v15, %v4140_v2  ;;  %v1309_v48 = vpop.f32.mrb[23].mxu0  ;;  %3456 = vpow2.f32 %v1493_v41  ;;  %v4193_v52 = vpop.eup %3438 }
 0x2fb   : > { %v1310_v47 = vadd.f32 %v4140_v2, %v1309_v48  ;;  %3458 = vpow2.f32 %v1497_v43  ;;  %v4196_v54 = vpop.eup %3440  ;;  %v1501_v58 = vmul.f32 1.442695, %v4193_v52  ;;  %v1515_v2 = vmul.f32 %v3437_v29, %v284_v53  ;;  %v290_v43 = vld [vmem:[%s4183_s12 + $0x30] sm:$0xff] }
 0x2fc   : > { %3460 = vpow2.f32 %v1495_v28  ;;  %v3443_v59 = vpop.eup %3442  ;;  %v1499_v33 = vmul.f32 1.442695, %v4196_v54  ;;  %v291_v28 = vld [vmem:[%s4183_s12 + $0x38] sm:$0xff] }
 0x2fd   : > { %v3117_v56 = vpop.f32.mrb[24].mxu0  ;;  %3462 = vtanh.f32 %v1315_v46  ;;  %v3445_v63 = vpop.eup %3444  ;;  %v1518_v16 = vmul.f32 %v3443_v59, %v287_v0 }
 0x2fe   : > { %v1410_v26 = vadd.f32 %v3117_v56, %v4191_v51  ;;  %v1404_v60 = vpop.f32.mrb[25].mxu0  ;;  %3464 = vtanh.f32 %v1310_v47  ;;  %v4203_v37 = vpop.eup %3446  ;;  %v1517_v55 = vmul.f32 %v3445_v63, %v286_v50 }
 0x2ff   : > { %v1405_v1 = vadd.f32 %v4191_v51, %v1404_v60  ;;  %v4206_v32 = vpop.eup %3448  ;;  %3466 = vpow2.f32 %v1499_v33  ;;  %v1505_v11 = vmul.f32 1.442695, %v4203_v37  ;;  %v292_v60 = vld [vmem:[%s4183_s12 + $0x40] sm:$0xff] }
 0x300   : > { %v3451_v4 = vpop.eup %3450  ;;  %v1503_v25 = vmul.f32 1.442695, %v4206_v32  ;;  %v4212_v5 = vadd.f32 %v1516_v49, %v1410_v26  ;;  %3468 = vpow2.f32 %v1501_v58 }
 0x301   : > { %v4208_v61 = vadd.f32 %v1515_v2, %v1405_v1  ;;  %v3120_v3 = vpop.f32.mrb[26].mxu0  ;;  %v1519_v39 = vmul.f32 %v3451_v4, %v288_v17  ;;  %v293_v1 = vld [vmem:[%s4183_s12 + $0x48] sm:$0xff] }
 0x302   : > { %v1420_v6 = vadd.f32 %v3120_v3, %v4191_v51  ;;  %v1414_v7 = vpop.f32.mrb[27].mxu0  ;;  %v4215_v9 = vpop.eup %3452  ;;  %3470 = vpow2.f32 %v1503_v25 }
 0x303   : > { %v1415_v12 = vadd.f32 %v4191_v51, %v1414_v7  ;;  %3173 = vmatprep.mubr.msk.f32.mxu1 %vm887_vm3, %v4208_v61  ;;  %v4221_v14 = vpop.eup %3454  ;;  %3472 = vpow2.f32 %v1505_v11  ;;  %v1509_v35 = vmul.f32 1.442695, %v4215_v9  ;;  %v294_v7 = vld [vmem:[%s4183_s12 + $0x50] sm:$0xff] }
 0x304   : > { %3174 = vmatmul.mubr.msk.f32.vlgmr.msra.gmra.mrb[24].mxu1 %vm887_vm3, %v4212_v5  ;;  %v3457_v19 = vpop.eup %3456  ;;  %v1507_v24 = vmul.f32 1.442695, %v4221_v14  ;;  %v4230_v27 = vadd.f32 %v1518_v16, %v1420_v6 }
 0x305   : > { %v4226_v20 = vadd.f32 %v1517_v55, %v1415_v12  ;;  %v3123_v44 = vpop.f32.mrb[28].mxu0  ;;  %v3459_v23 = vpop.eup %3458  ;;  %v1520_v57 = vmul.f32 %v3457_v19, %v289_v8  ;;  %v295_v55 = vld [vmem:[%s4183_s12 + $0x58] sm:$0xff] }
 0x306   : > { %v1430_v30 = vadd.f32 %v3123_v44, %v4191_v51  ;;  %v1424_v34 = vpop.f32.mrb[29].mxu0  ;;  %v3461_v62 = vpop.eup %3460  ;;  %3474 = vpow2.f32 %v1507_v24  ;;  %v1522_v26 = vmul.f32 %v3459_v23, %v291_v28 }
 0x307   : > { %v1425_v38 = vadd.f32 %v4191_v51, %v1424_v34  ;;  %3176 = vmatprep.mubr.msk.f32.mxu1 %vm887_vm3, %v4226_v20  ;;  %v4237_v41 = vpop.eup %3462  ;;  %3476 = vpow2.f32 %v1509_v35  ;;  %v1521_v59 = vmul.f32 %v3461_v62, %v290_v43  ;;  %v296_v34 = vld [vmem:[%s4183_s12 + $0x60] sm:$0xff] }
 0x308   : > { %3177 = vmatmul.mubr.msk.f32.gmra.mrb[26].mxu1 %vm887_vm3, %v4230_v27  ;;  %v4242_v15 = vpop.eup %3464  ;;  %v4248_v29 = vadd.f32 %v1520_v57, %v1430_v30  ;;  %v1513_v42 = vmul.f32 1.442695, %v4237_v41 }
 0x309   : > { %v4244_v22 = vadd.f32 %v1519_v39, %v1425_v38  ;;  %v3126_v46 = vpop.f32.mrb[30].mxu0  ;;  %v1511_v48 = vmul.f32 1.442695, %v4242_v15  ;;  %v3467_v33 = vpop.eup %3466  ;;  %v297_v38 = vld [vmem:[%s4183_s12 + $0x68] sm:$0xff] }
 0x30a   : > { %v1440_v47 = vadd.f32 %v3126_v46, %v4191_v51  ;;  %v1434_v53 = vpop.f32.mrb[31].mxu0  ;;  %v3469_v63 = vpop.eup %3468  ;;  %v1523_v4 = vmul.f32 %v3467_v33, %v292_v60  ;;  %v299_v33 = vld [vmem:[%s4183_s12 + $0x78] sm:$0xff] }
 0x30b   : > { %v1435_v56 = vadd.f32 %v4191_v51, %v1434_v53  ;;  %3179 = vmatprep.mubr.msk.f32.mxu1 %vm887_vm3, %v4244_v22  ;;  %3478 = vpow2.f32 %v1511_v48  ;;  %v1524_v6 = vmul.f32 %v3469_v63, %v293_v1 }
 0x30c   : > { %3180 = vmatmul.mubr.msk.f32.gmra.mrb[28].mxu1 %vm887_vm3, %v4248_v29  ;;  %v4261_v49 = vadd.f32 %v1522_v26, %v1440_v47  ;;  %3480 = vpow2.f32 %v1513_v42  ;;  %v3471_v25 = vpop.eup %3470  ;;  %v298_v42 = vld [vmem:[%s4183_s12 + $0x70] sm:$0xff] }
 0x30d   : > { %v4258_v58 = vadd.f32 %v1521_v59, %v1435_v56  ;;  %v3129_v2 = vpop.f32.mrb[32].mxu0  ;;  %v3473_v11 = vpop.eup %3472  ;;  %v1525_v23 = vmul.f32 %v3471_v25, %v294_v7  ;;  %v344_v25 = vld [vmem:[%s4677_s4 + $0x68] sm:$0xff]  ;;  %v4322_v7 = vld [vmem:[%s4676_s3 + $0x70] ss:$0 sm:$0xff] }
 0x30e   : > { %v1450_v50 = vadd.f32 %v3129_v2, %v4191_v51  ;;  %v1444_v0 = vpop.f32.mrb[33].mxu0  ;;  %v1526_v30 = vmul.f32 %v3473_v11, %v295_v55 }
 0x30f   : > { %v1445_v3 = vadd.f32 %v4191_v51, %v1444_v0  ;;  %3182 = vmatprep.mubr.msk.f32.mxu1 %vm887_vm3, %v4258_v58 }
 0x310   : > { %3183 = vmatmul.mubr.msk.f32.gmra.mrb[30].mxu1 %vm887_vm3, %v4261_v49  ;;  %v4273_v17 = vadd.f32 %v1524_v6, %v1450_v50  ;;  %v3475_v24 = vpop.eup %3474 }
 0x311   : > { %v4270_v12 = vadd.f32 %v1523_v4, %v1445_v3  ;;  %v3132_v16 = vpop.f32.mrb[34].mxu0  ;;  %v3477_v62 = vpop.eup %3476  ;;  %v1527_v48 = vmul.f32 %v3475_v24, %v296_v34 }
 0x312   : > { %v1460_v19 = vadd.f32 %v3132_v16, %v4191_v51  ;;  %v1454_v8 = vpop.f32.mrb[35].mxu0  ;;  %v1528_v53 = vmul.f32 %v3477_v62, %v297_v38 }
 0x313   : > { %v1455_v44 = vadd.f32 %v4191_v51, %v1454_v8  ;;  %3185 = vmatprep.mubr.msk.f32.mxu1 %vm887_vm3, %v4270_v12  ;;  %v345_v8 = vld [vmem:[%s4677_s4 + $0x70] sm:$0xff] }
 0x314   : > { %3186 = vmatmul.mubr.msk.f32.gmra.mrb[32].mxu1 %vm887_vm3, %v4273_v17  ;;  %v4285_v57 = vadd.f32 %v1526_v30, %v1460_v19 }
 0x315   : > { %v4282_v35 = vadd.f32 %v1525_v23, %v1455_v44  ;;  %v3135_v39 = vpop.f32.mrb[36].mxu0  ;;  %v3479_v47 = vpop.eup %3478  ;;  %v346_v44 = vld [vmem:[%s4677_s4 + $0x78] sm:$0xff] }
 0x316   : > { %v1470_v43 = vadd.f32 %v3135_v39, %v4191_v51  ;;  %v1464_v28 = vpop.f32.mrb[37].mxu0  ;;  %v3481_v56 = vpop.eup %3480  ;;  %v1529_v50 = vmul.f32 %v3479_v47, %v298_v42  ;;  %v3309_v38 = vpack.c.bf16 %v346_v44, %v345_v8 }
 0x317   : > { %v1465_v46 = vadd.f32 %v4191_v51, %v1464_v28  ;;  %3188 = vmatprep.mubr.msk.f32.mxu1 %vm887_vm3, %v4282_v35  ;;  %v1530_v0 = vmul.f32 %v3481_v56, %v299_v33 }
 0x318   : > { %3189 = vmatmul.mubr.msk.f32.gmra.mrb[34].mxu1 %vm887_vm3, %v4285_v57  ;;  %v4297_v60 = vadd.f32 %v1528_v53, %v1470_v43 }
 0x319   : > { %v4294_v59 = vadd.f32 %v1527_v48, %v1465_v46  ;;  %v3138_v26 = vpop.f32.mrb[38].mxu0 }
 0x31a   : > { %v1480_v63 = vadd.f32 %v3138_v26, %v4191_v51  ;;  %v1474_v1 = vpop.f32.mrb[39].mxu0 }
 0x31b   : > { %v1475_v2 = vadd.f32 %v4191_v51, %v1474_v1  ;;  %3191 = vmatprep.mubr.msk.f32.mxu1 %vm887_vm3, %v4294_v59  ;;  %v343_v51 = vld [vmem:[%s4677_s4 + $0x60] sm:$0xff] }
 0x31c   : > { %3192 = vmatmul.mubr.msk.f32.gmra.mrb[36].mxu1 %vm887_vm3, %v4297_v60  ;;  %v4307_v4 = vadd.f32 %v1530_v0, %v1480_v63  ;;  %v3305_v6 = vpack.c.bf16 %v344_v25, %v343_v51 }
 0x31d   : > { %v4305_v3 = vadd.f32 %v1529_v50, %v1475_v2 }
 0x31e   : > { %3306 = vmatprep.subr.bf16.mxu0 %v3305_v6 }
 0x31f   : > { %3194 = vmatprep.mubr.msk.f32.mxu1 %vm887_vm3, %v4305_v3 }
 0x320   : > { %3195 = vmatmul.mubr.msk.f32.gmra.mrb[38].mxu1 %vm887_vm3, %v4307_v4 }
 0x3d7   : > { %v3175_v11 = vpop.f32.mrb[24].mxu1 }
 0x3d8   : > { %v4325_v55 = vadd.f32 %v3175_v11, %v4322_v7  ;;  %v1809_v16 = vpop.f32.mrb[25].mxu1 }
 0x3d9   : > { %v4328_v19 = vadd.f32 %v4322_v7, %v1809_v16 }
 0x3da   : > { %v1909_v30 = vmax.f32 %v4325_v55, 0.0 }
 0x3db   : > { %v1908_v23 = vmax.f32 %v4328_v19, 0.0  ;;  %v3178_v24 = vpop.f32.mrb[26].mxu1 }
 0x3dc   : > { %v4339_v34 = vadd.f32 %v3178_v24, %v4322_v7  ;;  %v1819_v62 = vpop.f32.mrb[27].mxu1 }
 0x3dd   : > { %v1894_v39 = vadd.f32 %v4322_v7, %v1819_v62  ;;  %3205 = vmatprep.mubr.msk.f32.mxu0 %vm693_vm2, %v1908_v23 }
 0x3de   : > { %3206 = vmatmul.mubr.msk.f32.vlgmr.msra.gmra.mrb[40].mxu0 %vm693_vm2, %v1909_v30  ;;  %v1911_v46 = vmax.f32 %v4339_v34, 0.0 }
 0x3df   : > { %v1910_v43 = vmax.f32 %v1894_v39, 0.0  ;;  %3308 = vmatpush3.bf16.msra.mxu0 %v3305_v6  ;;  %v3181_v28 = vpop.f32.mrb[28].mxu1 }
 0x3e0   : > { %v1897_v48 = vadd.f32 %v3181_v28, %v4322_v7  ;;  %v1829_v47 = vpop.f32.mrb[29].mxu1  ;;  %3310 = vmatprep.subr.bf16.mxu0 %v3309_v38 }
 0x3e1   : > { %v1896_v53 = vadd.f32 %v4322_v7, %v1829_v47  ;;  %3208 = vmatprep.mubr.msk.f32.mxu0 %vm693_vm2, %v1910_v43 }
 0x3e2   : > { %3209 = vmatmul.mubr.msk.f32.gmra.mrb[42].mxu0 %vm693_vm2, %v1911_v46  ;;  %v1913_v33 = vmax.f32 %v1897_v48, 0.0 }
 0x3e3   : > { %v1912_v42 = vmax.f32 %v1896_v53, 0.0  ;;  %v3184_v56 = vpop.f32.mrb[30].mxu1  ;;  %3312 = vmatpush3.bf16.msra.mxu0 %v3309_v38 }
 0x3e4   : > { %v1899_v26 = vadd.f32 %v3184_v56, %v4322_v7  ;;  %v1839_v63 = vpop.f32.mrb[31].mxu1 }
 0x3e5   : > { %v1898_v1 = vadd.f32 %v4322_v7, %v1839_v63  ;;  %3211 = vmatprep.mubr.msk.f32.mxu0 %vm693_vm2, %v1912_v42 }
 0x3e6   : > { %3212 = vmatmul.mubr.msk.f32.gmra.mrb[44].mxu0 %vm693_vm2, %v1913_v33  ;;  %v1915_v0 = vmax.f32 %v1899_v26, 0.0 }
 0x3e7   : > { %v1914_v2 = vmax.f32 %v1898_v1, 0.0  ;;  %v3187_v50 = vpop.f32.mrb[32].mxu1 }
 0x3e8   : > { %v1901_v51 = vadd.f32 %v3187_v50, %v4322_v7  ;;  %v1849_v25 = vpop.f32.mrb[33].mxu1 }
 0x3e9   : > { %v1900_v6 = vadd.f32 %v4322_v7, %v1849_v25  ;;  %3214 = vmatprep.mubr.msk.f32.mxu0 %vm693_vm2, %v1914_v2 }
 0x3ea   : > { %3215 = vmatmul.mubr.msk.f32.gmra.mrb[46].mxu0 %vm693_vm2, %v1915_v0  ;;  %v1917_v8 = vmax.f32 %v1901_v51, 0.0 }
 0x3eb   : > { %v1916_v11 = vmax.f32 %v1900_v6, 0.0  ;;  %v3190_v16 = vpop.f32.mrb[34].mxu1 }
 0x3ec   : > { %v1903_v44 = vadd.f32 %v3190_v16, %v4322_v7  ;;  %v1859_v24 = vpop.f32.mrb[35].mxu1 }
 0x3ed   : > { %v1902_v34 = vadd.f32 %v4322_v7, %v1859_v24  ;;  %3217 = vmatprep.mubr.msk.f32.mxu0 %vm693_vm2, %v1916_v11 }
 0x3ee   : > { %3218 = vmatmul.mubr.msk.f32.gmra.mrb[48].mxu0 %vm693_vm2, %v1917_v8  ;;  %v1919_v39 = vmax.f32 %v1903_v44, 0.0 }
 0x3ef   : > { %v1918_v62 = vmax.f32 %v1902_v34, 0.0  ;;  %v3193_v38 = vpop.f32.mrb[36].mxu1 }
 0x3f0   : > { %v1905_v28 = vadd.f32 %v3193_v38, %v4322_v7  ;;  %v1869_v48 = vpop.f32.mrb[37].mxu1 }
 0x3f1   : > { %v1904_v47 = vadd.f32 %v4322_v7, %v1869_v48  ;;  %3220 = vmatprep.mubr.msk.f32.mxu0 %vm693_vm2, %v1918_v62 }
 0x3f2   : > { %3221 = vmatmul.mubr.msk.f32.gmra.mrb[50].mxu0 %vm693_vm2, %v1919_v39  ;;  %v1921_v26 = vmax.f32 %v1905_v28, 0.0 }
 0x3f3   : > { %v1920_v53 = vmax.f32 %v1904_v47, 0.0  ;;  %v3196_v56 = vpop.f32.mrb[38].mxu1 }
 0x3f4   : > { %v1907_v63 = vadd.f32 %v3196_v56, %v4322_v7  ;;  %v1879_v1 = vpop.f32.mrb[39].mxu1 }
 0x3f5   : > { %v1906_v50 = vadd.f32 %v4322_v7, %v1879_v1  ;;  %3223 = vmatprep.mubr.msk.f32.mxu0 %vm693_vm2, %v1920_v53  ;;  %v4398_v7 = vld [vmem:[%s4677_s4 + $0x90] ss:$0 sm:$0xff] }
 0x3f6   : > { %3224 = vmatmul.mubr.msk.f32.gmra.mrb[52].mxu0 %vm693_vm2, %v1921_v26  ;;  %v1923_v25 = vmax.f32 %v1907_v63, 0.0 }
 0x3f7   : > { %v1922_v51 = vmax.f32 %v1906_v50, 0.0 }
 0x3f9   : > { %3226 = vmatprep.mubr.msk.f32.mxu0 %vm693_vm2, %v1922_v51 }
 0x3fa   : > { %3227 = vmatmul.mubr.msk.f32.gmra.mrb[54].mxu0 %vm693_vm2, %v1923_v25 }
 0x3fb   : > { %3237 = vmatprep.mubr.msk.f32.mxu0 %vm693_vm2, %v1908_v23 }
 0x3fe   : > { %3238 = vmatmul.mubr.msk.f32.vlgmr.msra.gmra.mrb[56].mxu0 %vm693_vm2, %v1909_v30 }
 0x3ff   : > { %3240 = vmatprep.mubr.msk.f32.mxu0 %vm693_vm2, %v1910_v43 }
 0x402   : > { %3241 = vmatmul.mubr.msk.f32.gmra.mrb[58].mxu0 %vm693_vm2, %v1911_v46 }
 0x403   : > { %3243 = vmatprep.mubr.msk.f32.mxu0 %vm693_vm2, %v1912_v42 }
 0x406   : > { %3244 = vmatmul.mubr.msk.f32.gmra.mrb[60].mxu0 %vm693_vm2, %v1913_v33 }
 0x407   : > { %3246 = vmatprep.mubr.msk.f32.mxu0 %vm693_vm2, %v1914_v2 }
 0x40a   : > { %3247 = vmatmul.mubr.msk.f32.gmra.mrb[62].mxu0 %vm693_vm2, %v1915_v0 }
 0x40b   : > { %3249 = vmatprep.mubr.msk.f32.mxu0 %vm693_vm2, %v1916_v11 }
 0x40e   : > { %3250 = vmatmul.mubr.msk.f32.gmra.mrb[64].mxu0 %vm693_vm2, %v1917_v8 }
 0x40f   : > { %3252 = vmatprep.mubr.msk.f32.mxu0 %vm693_vm2, %v1918_v62 }
 0x412   : > { %3253 = vmatmul.mubr.msk.f32.gmra.mrb[66].mxu0 %vm693_vm2, %v1919_v39 }
 0x413   : > { %3255 = vmatprep.mubr.msk.f32.mxu0 %vm693_vm2, %v1920_v53 }
 0x416   : > { %3256 = vmatmul.mubr.msk.f32.gmra.mrb[68].mxu0 %vm693_vm2, %v1921_v26 }
 0x417   : > { %3258 = vmatprep.mubr.msk.f32.mxu0 %vm693_vm2, %v1922_v51 }
 0x41a   : > { %3259 = vmatmul.mubr.msk.f32.gmra.mrb[70].mxu0 %vm693_vm2, %v1923_v25 }
 0x4b1   : > { %v3207_v55 = vpop.f32.mrb[40].mxu0 }
 0x4b2   : > { %v2048_v19 = vadd.f32 %v3207_v55, %v4398_v7  ;;  %v2042_v23 = vpop.f32.mrb[41].mxu0 }
 0x4b3   : > { %v2043_v30 = vadd.f32 %v4398_v7, %v2042_v23  ;;  %v4422_v23 = vmul.f32 %v4212_v5, %v4212_v5  ;;  %v4439_v5 = vmul.f32 %v4248_v29, %v4248_v29 }
 0x4b4   : > { %3482 = vtanh.f32 %v2048_v19 }
 0x4b5   : > { %3484 = vtanh.f32 %v2043_v30  ;;  %v3210_v43 = vpop.f32.mrb[42].mxu0 }
 0x4b6   : > { %v2058_v46 = vadd.f32 %v3210_v43, %v4398_v7  ;;  %v2052_v42 = vpop.f32.mrb[43].mxu0 }
 0x4b7   : > { %v2053_v33 = vadd.f32 %v4398_v7, %v2052_v42  ;;  %v4431_v42 = vmul.f32 %v4230_v27, %v4230_v27  ;;  %v4447_v27 = vmul.f32 %v4261_v49, %v4261_v49  ;;  %v4461_v49 = vmul.f32 %v4270_v12, %v4270_v12 }
 0x4b8   : > { %3486 = vtanh.f32 %v2058_v46  ;;  %v4427_v46 = vmul.f32 %v4208_v61, %v4208_v61  ;;  %v4481_v12 = vmul.f32 %v4307_v4, %v4307_v4  ;;  %v4492_v4 = vld [vmem:[%s4677_s4 + $0x98] ss:$0 sm:$0xff] }
 0x4b9   : > { %3488 = vtanh.f32 %v2053_v33  ;;  %v3213_v2 = vpop.f32.mrb[44].mxu0 }
 0x4ba   : > { %v2068_v0 = vadd.f32 %v3213_v2, %v4398_v7  ;;  %v2062_v6 = vpop.f32.mrb[45].mxu0  ;;  %v4435_v2 = vmul.f32 %v4226_v20, %v4226_v20 }
 0x4bb   : > { %v2063_v11 = vadd.f32 %v4398_v7, %v2062_v6 }
 0x4bc   : > { %3490 = vtanh.f32 %v2068_v0  ;;  %v4443_v0 = vmul.f32 %v4244_v22, %v4244_v22  ;;  %v4456_v22 = vmul.f32 %v4273_v17, %v4273_v17 }
 0x4bd   : > { %3492 = vtanh.f32 %v2063_v11  ;;  %v3216_v16 = vpop.f32.mrb[46].mxu0  ;;  %v4451_v11 = vmul.f32 %v4258_v58, %v4258_v58  ;;  %v4465_v58 = vmul.f32 %v4285_v57, %v4285_v57 }
 0x4be   : > { %v4406_v8 = vpop.eup %3482  ;;  %v2078_v44 = vadd.f32 %v3216_v16, %v4398_v7  ;;  %v2072_v24 = vpop.f32.mrb[47].mxu0 }
 0x4bf   : > { %v4409_v34 = vpop.eup %3484  ;;  %v2288_v62 = vmul.f32 1.442695, %v4406_v8  ;;  %v2073_v38 = vadd.f32 %v4398_v7, %v2072_v24 }
 0x4c0   : > { %v2286_v39 = vmul.f32 1.442695, %v4409_v34  ;;  %3494 = vtanh.f32 %v2078_v44 }
 0x4c1   : > { %3496 = vpow2.f32 %v2288_v62  ;;  %v3219_v28 = vpop.f32.mrb[48].mxu0 }
 0x4c2   : > { %v4414_v48 = vpop.eup %3486  ;;  %3498 = vpow2.f32 %v2286_v39  ;;  %v2088_v47 = vadd.f32 %v3219_v28, %v4398_v7  ;;  %v2082_v53 = vpop.f32.mrb[49].mxu0  ;;  %v4473_v39 = vmul.f32 %v4297_v60, %v4297_v60  ;;  %v4477_v28 = vmul.f32 %v4294_v59, %v4294_v59 }
 0x4c3   : > { %v3489_v56 = vpop.eup %3488  ;;  %v2292_v26 = vmul.f32 1.442695, %v4414_v48  ;;  %3500 = vtanh.f32 %v2073_v38  ;;  %v2083_v63 = vadd.f32 %v4398_v7, %v2082_v53  ;;  %v4469_v38 = vmul.f32 %v4282_v35, %v4282_v35 }
 0x4c4   : > { %v2290_v1 = vmul.f32 1.442695, %v3489_v56  ;;  %3502 = vtanh.f32 %v2088_v47  ;;  %v4486_v60 = vadd.f32 %v4406_v8, %v4148_v10  ;;  %v4503_v8 = vadd.f32 %v3489_v56, %v4159_v21 }
 0x4c5   : > { %3504 = vpow2.f32 %v2292_v26  ;;  %v3222_v50 = vpop.f32.mrb[50].mxu0 }
 0x4c6   : > { %v3491_v51 = vpop.eup %3490  ;;  %3506 = vpow2.f32 %v2290_v1  ;;  %v2098_v25 = vadd.f32 %v3222_v50, %v4398_v7  ;;  %v2092_v55 = vpop.f32.mrb[51].mxu0  ;;  %v4496_v50 = vadd.f32 %v4409_v34, %v4151_v13  ;;  %v3546_v13 = vld [vmem:[%s3964_s10 + $0x8] sm:$0xff] }
 0x4c7   : > { %v3493_v19 = vpop.eup %3492  ;;  %v2296_v30 = vmul.f32 1.442695, %v3491_v51  ;;  %3508 = vtanh.f32 %v2083_v63  ;;  %v2093_v43 = vadd.f32 %v4398_v7, %v2092_v55  ;;  %v4509_v55 = vadd.f32 %v3491_v51, %v4168_v40 }
 0x4c8   : > { %v2294_v33 = vmul.f32 1.442695, %v3493_v19  ;;  %3510 = vtanh.f32 %v2098_v25  ;;  %v4500_v25 = vadd.f32 %v4414_v48, %v4156_v18 }
 0x4c9   : > { %3512 = vpow2.f32 %v2296_v30  ;;  %v3225_v61 = vpop.f32.mrb[52].mxu0 }
 0x4ca   : > { %v3495_v6 = vpop.eup %3494  ;;  %3514 = vpow2.f32 %v2294_v33  ;;  %v2108_v20 = vadd.f32 %v3225_v61, %v4398_v7  ;;  %v2102_v29 = vpop.f32.mrb[53].mxu0  ;;  %v3547_v33 = vld [vmem:[%s3964_s10] sm:$0xff] }
 0x4cb   : > { %v3497_v16 = vpop.eup %3496  ;;  %v2300_v44 = vmul.f32 1.442695, %v3495_v6  ;;  %3516 = vtanh.f32 %v2093_v43  ;;  %v2103_v24 = vadd.f32 %v4398_v7, %v2102_v29  ;;  %v4514_v18 = vadd.f32 %v3495_v6, %v4171_v36 }
 0x4cc   : > { %v3499_v62 = vpop.eup %3498  ;;  %3518 = vtanh.f32 %v2108_v20  ;;  %v2319_v34 = vmul.f32 %v3546_v13, %v3497_v16  ;;  %v3548_v16 = vld [vmem:[%s3964_s10 + $0x18] sm:$0xff] }
 0x4cd   : > { %v3501_v17 = vpop.eup %3500  ;;  %3520 = vpow2.f32 %v2300_v44  ;;  %v3228_v57 = vpop.f32.mrb[54].mxu0  ;;  %v2318_v61 = vmul.f32 %v3547_v33, %v3499_v62 }
 0x4ce   : > { %v3503_v47 = vpop.eup %3502  ;;  %v2298_v53 = vmul.f32 1.442695, %v3501_v17  ;;  %3522 = vtanh.f32 %v2103_v24  ;;  %v2118_v35 = vadd.f32 %v3228_v57, %v4398_v7  ;;  %v2112_v26 = vpop.f32.mrb[55].mxu0  ;;  %v4518_v40 = vadd.f32 %v3501_v17, %v4177_v45  ;;  %v3549_v24 = vld [vmem:[%s3964_s10 + $0x10] sm:$0xff] }
 0x4cf   : > { %v3505_v63 = vpop.eup %3504  ;;  %v2304_v59 = vmul.f32 1.442695, %v3503_v47  ;;  %v2113_v1 = vadd.f32 %v4398_v7, %v2112_v26  ;;  %v4506_v7 = vadd.f32 %v3493_v19, %v4165_v31  ;;  %v4522_v29 = vadd.f32 %v3503_v47, %v4193_v52 }
 0x4d0   : > { %v3507_v10 = vpop.eup %3506  ;;  %3524 = vpow2.f32 %v2298_v53  ;;  %v2321_v44 = vmul.f32 %v3548_v16, %v3505_v63 }
 0x4d1   : > { %v3509_v30 = vpop.eup %3508  ;;  %3526 = vpow2.f32 %v2304_v59  ;;  %v3239_v43 = vpop.f32.mrb[56].mxu0  ;;  %v2320_v62 = vmul.f32 %v3549_v24, %v3507_v10 }
 0x4d2   : > { %v3511_v48 = vpop.eup %3510  ;;  %v2302_v21 = vmul.f32 1.442695, %v3509_v30  ;;  %3528 = vtanh.f32 %v2118_v35  ;;  %v2213_v31 = vadd.f32 %v3239_v43, %v4492_v4  ;;  %v2207_v56 = vpop.f32.mrb[57].mxu0  ;;  %v4527_v53 = vadd.f32 %v3509_v30, %v4196_v54  ;;  %v3551_v54 = vld [vmem:[%s3964_s10 + $0x20] sm:$0xff] }
 0x4d3   : > { %v3513_v51 = vpop.eup %3512  ;;  %v2308_v19 = vmul.f32 1.442695, %v3511_v48  ;;  %3530 = vtanh.f32 %v2113_v1  ;;  %v2208_v20 = vadd.f32 %v4492_v4, %v2207_v56  ;;  %v4530_v35 = vadd.f32 %v3511_v48, %v4203_v37  ;;  %v3550_v1 = vld [vmem:[%s3964_s10 + $0x28] sm:$0xff] }
 0x4d4   : > { %v3515_v36 = vpop.eup %3514  ;;  %3532 = vpow2.f32 %v2302_v21  ;;  %v2335_v6 = vadd.f32 %v2319_v34, %v2213_v31  ;;  %v2323_v10 = vmul.f32 %v3550_v1, %v3513_v51 }
 0x4d5   : > { %v3517_v57 = vpop.eup %3516  ;;  %3534 = vpow2.f32 %v2308_v19  ;;  %v2334_v45 = vadd.f32 %v2318_v61, %v2208_v20  ;;  %v3242_v17 = vpop.f32.mrb[58].mxu0  ;;  %v2322_v30 = vmul.f32 %v3551_v54, %v3515_v36 }
 0x4d6   : > { %v4532_v52 = vpop.eup %3518  ;;  %v2306_v47 = vmul.f32 1.442695, %v3517_v57  ;;  %v2367_v26 = vmul.f32 %v2335_v6, %v2335_v6  ;;  %v2223_v59 = vadd.f32 %v3242_v17, %v4492_v4  ;;  %v2217_v63 = vpop.f32.mrb[59].mxu0  ;;  %v4543_v21 = vadd.f32 %v3517_v57, %v4206_v32  ;;  %v3553_v17 = vld [vmem:[%s3964_s10 + $0x30] sm:$0xff] }
 0x4d7   : > { %v3521_v43 = vpop.eup %3520  ;;  %v2312_v13 = vmul.f32 1.442695, %v4532_v52  ;;  %v2366_v34 = vmul.f32 %v2334_v45, %v2334_v45  ;;  %v2218_v33 = vadd.f32 %v4492_v4, %v2217_v63 }
 0x4d8   : > { %v4539_v37 = vpop.eup %3522  ;;  %3536 = vpow2.f32 %v2306_v47  ;;  %v2337_v61 = vadd.f32 %v2321_v44, %v2223_v59  ;;  %v2399_v48 = vadd.f32 %v4422_v23, %v2367_v26  ;;  %v3552_v44 = vld [vmem:[%s3964_s10 + $0x38] sm:$0xff]  ;;  %v3554_v59 = vld [vmem:[%s3964_s10 + $0x48] sm:$0xff] }
 0x4d9   : > { %3538 = vpow2.f32 %v2312_v13  ;;  %v2310_v31 = vmul.f32 1.442695, %v4539_v37  ;;  %v2336_v56 = vadd.f32 %v2320_v62, %v2218_v33  ;;  %v3245_v51 = vpop.f32.mrb[60].mxu0  ;;  %v2398_v19 = vadd.f32 %v4427_v46, %v2366_v34 }
 0x4da   : > { %v3525_v20 = vpop.eup %3524  ;;  %v2369_v36 = vmul.f32 %v2337_v61, %v2337_v61  ;;  %v2233_v6 = vadd.f32 %v3245_v51, %v4492_v4  ;;  %v2227_v16 = vpop.f32.mrb[61].mxu0  ;;  %v2325_v24 = vmul.f32 %v3552_v44, %v3521_v43  ;;  %v2415_v23 = vmul.f32 0.5, %v2399_v48 }
 0x4db   : > { %v3527_v45 = vpop.eup %3526  ;;  %3540 = vpow2.f32 %v2310_v31  ;;  %v2368_v32 = vmul.f32 %v2336_v56, %v2336_v56  ;;  %v2228_v57 = vadd.f32 %v4492_v4, %v2227_v16  ;;  %v2324_v47 = vmul.f32 %v3553_v17, %v3525_v20 }
 0x4dc   : > { %v4551_v62 = vpop.eup %3528  ;;  %v2339_v26 = vadd.f32 %v2323_v10, %v2233_v6  ;;  %v2431_v46 = vsub.f32 %v4486_v60, %v2415_v23  ;;  %v2327_v63 = vmul.f32 %v3554_v59, %v3527_v45  ;;  %v2414_v1 = vmul.f32 0.5, %v2398_v19  ;;  %v3555_v6 = vld [vmem:[%s3964_s10 + $0x40] sm:$0xff]  ;;  %v3556_v45 = vld [vmem:[%s3964_s10 + $0x58] sm:$0xff] }
 0x4dd   : > { %v4555_v13 = vpop.eup %3530  ;;  %v2316_v43 = vmul.f32 1.442695, %v4551_v62  ;;  %v2338_v34 = vadd.f32 %v2322_v30, %v2228_v57  ;;  %v3248_v33 = vpop.f32.mrb[62].mxu0  ;;  %v2400_v54 = vadd.f32 %v4435_v2, %v2368_v32  ;;  %v2401_v61 = vadd.f32 %v4431_v42, %v2369_v36 }
 0x4de   : > { %v3533_v48 = vpop.eup %3532  ;;  %v2314_v31 = vmul.f32 1.442695, %v4555_v13  ;;  %v2371_v10 = vmul.f32 %v2339_v26, %v2339_v26  ;;  %v2243_v60 = vadd.f32 %v3248_v33, %v4492_v4  ;;  %v2237_v56 = vpop.f32.mrb[63].mxu0  ;;  %v2449_v51 = vsel %vm887_vm3, %v2431_v46, 0.0  ;;  %v3557_v33 = vld [vmem:[%s3964_s10 + $0x50] sm:$0xff] }
 0x4df   : > { %v3535_v19 = vpop.eup %3534  ;;  %3542 = vpow2.f32 %v2316_v43  ;;  %v2370_v20 = vmul.f32 %v2338_v34, %v2338_v34  ;;  %v2238_v30 = vadd.f32 %v4492_v4, %v2237_v56  ;;  %2450 = vadd.xlane.f32.xlu0 %v2449_v51  ;;  %v2326_v2 = vmul.f32 %v3555_v6, %v3533_v48 }
 0x4e0   : > { %3544 = vpow2.f32 %v2314_v31  ;;  %v2341_v42 = vadd.f32 %v2325_v24, %v2243_v60  ;;  %v2430_v36 = vsub.f32 %v4496_v50, %v2414_v1  ;;  %v2416_v16 = vmul.f32 0.5, %v2400_v54  ;;  %v3558_v60 = vld [vmem:[%s3964_s10 + $0x68] sm:$0xff] }
 0x4e1   : > { %v2340_v44 = vadd.f32 %v2324_v47, %v2238_v30  ;;  %v3251_v23 = vpop.f32.mrb[64].mxu0  ;;  %v2329_v32 = vmul.f32 %v3556_v45, %v3535_v19  ;;  %v2417_v57 = vmul.f32 0.5, %v2401_v61  ;;  %v2402_v17 = vadd.f32 %v4443_v0, %v2370_v20 }
 0x4e2   : > { %v3537_v26 = vpop.eup %3536  ;;  %v2373_v46 = vmul.f32 %v2341_v42, %v2341_v42  ;;  %v2253_v59 = vadd.f32 %v3251_v23, %v4492_v4  ;;  %v2247_v43 = vpop.f32.mrb[65].mxu0  ;;  %v2446_v34 = vsel %vm887_vm3, %v2430_v36, 0.0  ;;  %v2432_v24 = vsub.f32 %v4503_v8, %v2416_v16  ;;  %v3559_v16 = vld [vmem:[%s3964_s10 + $0x60] sm:$0xff] }
 0x4e3   : > { %v3539_v50 = vpop.eup %3538  ;;  %v2372_v1 = vmul.f32 %v2340_v44, %v2340_v44  ;;  %v2248_v47 = vadd.f32 %v4492_v4, %v2247_v43  ;;  %2447 = vadd.xlane.f32.xlu0 %v2446_v34  ;;  %v2328_v54 = vmul.f32 %v3557_v33, %v3537_v26  ;;  %v2433_v61 = vsub.f32 %v4500_v25, %v2417_v57 }
 0x4e4   : > { %v2343_v0 = vadd.f32 %v2327_v63, %v2253_v59  ;;  %v2452_v48 = vsel %vm887_vm3, %v2432_v24, 0.0  ;;  %v2418_v31 = vmul.f32 0.5, %v2402_v17  ;;  %v2331_v56 = vmul.f32 %v3558_v60, %v3539_v50 }
 0x4e5   : > { %v3541_v51 = vpop.eup %3540  ;;  %v2342_v19 = vadd.f32 %v2326_v2, %v2248_v47  ;;  %2453 = vadd.xlane.f32.xlu1 %v2452_v48  ;;  %v3254_v8 = vpop.f32.mrb[66].mxu0  ;;  %v2455_v20 = vsel %vm887_vm3, %v2433_v61, 0.0  ;;  %v2403_v30 = vadd.f32 %v4439_v5, %v2371_v10  ;;  %v2404_v6 = vadd.f32 %v4451_v11, %v2372_v1  ;;  %v3560_v47 = vld [vmem:[%s3964_s10 + $0x78] sm:$0xff]  ;;  %v3561_v48 = vld [vmem:[%s3964_s10 + $0x70] sm:$0xff]  ;;  %s248_s10 = sand.u32 1, %s3616_s19  }
 0x4e6   : > { %v2375_v42 = vmul.f32 %v2343_v0, %v2343_v0  ;;  %v2263_v25 = vadd.f32 %v3254_v8, %v4492_v4  ;;  %v2257_v63 = vpop.f32.mrb[67].mxu0  ;;  %v2434_v36 = vsub.f32 %v4506_v7, %v2418_v31  ;;  %v2330_v44 = vmul.f32 %v3559_v16, %v3541_v51  ;;  %s249_s14 = scalar_lea.vmem [#allocation2], %s248_s10  ;;  %s2544_s22 = scalar_lea.sflag [#allocation3], %s248_s10 }
 0x4e7   : > { %v2374_v23 = vmul.f32 %v2342_v19, %v2342_v19  ;;  %v2258_v45 = vadd.f32 %v4492_v4, %v2257_v63  ;;  %v2419_v2 = vmul.f32 0.5, %v2403_v30  ;;  %v2420_v57 = vmul.f32 0.5, %v2404_v6  ;;  %s2556_s11 = sshll.u32 %s249_s14, 4  ;;  %s4627_s11 = int_to_ptr.vmem [resolvable:$true] %s2556_s11 }
 0x4e8   : > { %v2345_v17 = vadd.f32 %v2329_v32, %v2263_v25  ;;  %v2458_v26 = vsel %vm887_vm3, %v2434_v36, 0.0  ;;  %v2405_v5 = vadd.f32 %v4447_v27, %v2373_v46  ;;  %v2407_v11 = vadd.f32 %v4456_v22, %v2375_v42  ;;  %s3562_s23 = scalar_lea.vmem %s4627_s11, 16  ;;  %p3569_p0 = scmp.lt.s32.totalorder %s4627_s11, %s3567_s26 }
 0x4e9   : > { %v3543_v10 = vpop.eup %3542  ;;  %v2344_v59 = vadd.f32 %v2328_v54, %v2258_v45  ;;  %2456 = vadd.xlane.f32.xlu1 %v2455_v20  ;;  %2459 = vadd.xlane.f32.xlu0 %v2458_v26  ;;  %v3257_v7 = vpop.f32.mrb[68].mxu0  ;;  %v2435_v43 = vsub.f32 %v4509_v55, %v2419_v2  ;;  %v2436_v34 = vsub.f32 %v4518_v40, %v2420_v57  ;;  %p3563_p11 = scmp.ne.s32.totalorder %s4627_s11, %s3562_s23  ;;  %p3570_p1 = scmp.lt.s32.totalorder %s3568_s30, %s3562_s23 }
 0x4ea   : > { %v3545_v24 = vpop.eup %3544  ;;  %v2377_v50 = vmul.f32 %v2345_v17, %v2345_v17  ;;  %v2273_v32 = vadd.f32 %v3257_v7, %v4492_v4  ;;  %v2267_v1 = vpop.f32.mrb[69].mxu0  ;;  %v2333_v33 = vmul.f32 %v3560_v47, %v3543_v10  ;;  %v2421_v27 = vmul.f32 0.5, %v2405_v5 }
 0x4eb   : > { %v2376_v46 = vmul.f32 %v2344_v59, %v2344_v59  ;;  %v2268_v22 = vadd.f32 %v4492_v4, %v2267_v1  ;;  %v2461_v54 = vsel %vm887_vm3, %v2435_v43, 0.0  ;;  %v2464_v61 = vsel %vm887_vm3, %v2436_v34, 0.0  ;;  %p3564_p12 = pnand %p3563_p11, %p3692_p5  ;;  %p3571_p2 = por %p3570_p1, %p3569_p0 }
 0x4ec   : > { %v2347_v0 = vadd.f32 %v2331_v56, %v2273_v32  ;;  %v2332_v55 = vmul.f32 %v3561_v48, %v3545_v24  ;;  %v2437_v40 = vsub.f32 %v4514_v18, %v2421_v27  ;;  %v2406_v31 = vadd.f32 %v4461_v49, %v2374_v23 }
 0x4ed   : > { %v2346_v60 = vadd.f32 %v2330_v44, %v2268_v22  ;;  %2462 = vadd.xlane.f32.xlu1 %v2461_v54  ;;  %2465 = vadd.xlane.f32.xlu0 %v2464_v61  ;;  %v3260_v51 = vpop.f32.mrb[70].mxu0  ;;  %v2423_v19 = vmul.f32 0.5, %v2407_v11  ;;  %v2408_v8 = vadd.f32 %v4469_v38, %v2376_v46  ;;  %v2409_v20 = vadd.f32 %v4465_v58, %v2377_v50  ;;  %p3565_p13 = pneg %p3564_p12 }
 0x4ee   : > { %v2379_v30 = vmul.f32 %v2347_v0, %v2347_v0  ;;  %v2283_v6 = vadd.f32 %v3260_v51, %v4492_v4  ;;  %v2277_v42 = vpop.f32.mrb[71].mxu0  ;;  %v2467_v56 = vsel %vm887_vm3, %v2437_v40, 0.0  ;;  %v2422_v25 = vmul.f32 0.5, %v2406_v31 }
 0x4ef   : > { %v2378_v63 = vmul.f32 %v2346_v60, %v2346_v60  ;;  %v2278_v18 = vadd.f32 %v4492_v4, %v2277_v42  ;;  %v2439_v49 = vsub.f32 %v4522_v29, %v2423_v19  ;;  %v2424_v36 = vmul.f32 0.5, %v2408_v8  ;;  %p3572_p3 = pnand %p3571_p2, %p3565_p13 }
 0x4f0   : > { %v2349_v16 = vadd.f32 %v2333_v33, %v2283_v6  ;;  %v2438_v44 = vsub.f32 %v4527_v53, %v2422_v25  ;;  %v2425_v23 = vmul.f32 0.5, %v2409_v20  ;;  %v2411_v38 = vadd.f32 %v4473_v39, %v2379_v30 }
 0x4f1   : > { %v2348_v58 = vadd.f32 %v2332_v55, %v2278_v18  ;;  %2468 = vadd.xlane.f32.xlu1 %v2467_v56  ;;  %v2440_v45 = vsub.f32 %v4543_v21, %v2424_v36  ;;  %v2410_v2 = vadd.f32 %v4477_v28, %v2378_v63  ;;  %v2363_v57 = vadd.f32 %v4532_v52, %v4215_v9 }
 0x4f2   : > { %v2381_v17 = vmul.f32 %v2349_v16, %v2349_v16  ;;  %v2470_v4 = vsel %vm887_vm3, %v2438_v44, 0.0  ;;  %v2441_v29 = vsub.f32 %v4530_v35, %v2425_v23  ;;  %v2427_v26 = vmul.f32 0.5, %v2411_v38 }
 0x4f3   : > { %v2396_v53 = vmul.f32 %v4305_v3, %v4305_v3  ;;  %v2380_v5 = vmul.f32 %v2348_v58, %v2348_v58  ;;  %2471 = vadd.xlane.f32.xlu0 %v2470_v4  ;;  %v2362_v39 = vadd.f32 %v4539_v37, %v4221_v14  ;;  %v2426_v21 = vmul.f32 0.5, %v2410_v2 }
 0x4f4   : > { %v2473_v28 = vsel %vm887_vm3, %v2439_v49, 0.0  ;;  %v2476_v11 = vsel %vm887_vm3, %v2440_v45, 0.0  ;;  %v2443_v9 = vsub.f32 %v2363_v57, %v2427_v26  ;;  %v2413_v52 = vadd.f32 %v4481_v12, %v2381_v17 }
 0x4f5   : > { %2474 = vadd.xlane.f32.xlu1 %v2473_v28  ;;  %v2442_v10 = vsub.f32 %v2362_v39, %v2426_v21  ;;  %v2412_v35 = vadd.f32 %v2396_v53, %v2380_v5  ;;  %v2365_v59 = vadd.f32 %v4551_v62, %v4237_v41  ;;  %v2364_v7 = vadd.f32 %v4555_v13, %v4242_v15 }
 0x4f6   : > { %v2429_v3 = vmul.f32 0.5, %v2413_v52  ;;  %v2479_v37 = vsel %vm887_vm3, %v2441_v29, 0.0  ;;  %v2485_v12 = vsel %vm887_vm3, %v2443_v9, 0.0 }
 0x4f7   : > { %2477 = vadd.xlane.f32.xlu0 %v2476_v11  ;;  %v2428_v14 = vmul.f32 0.5, %v2412_v35  ;;  %v2482_v43 = vsel %vm887_vm3, %v2442_v10, 0.0 }
 0x4f8   : > { %v2445_v34 = vsub.f32 %v2365_v59, %v2429_v3 }
 0x4f9   : > { %2480 = vadd.xlane.f32.xlu1 %v2479_v37  ;;  %v2444_v24 = vsub.f32 %v2364_v7, %v2428_v14 }
 0x4fa   : > { %v2491_v41 = vsel %vm887_vm3, %v2445_v34, 0.0 }
 0x4fb   : > { %2483 = vadd.xlane.f32.xlu0 %v2482_v43  ;;  %v2488_v50 = vsel %vm887_vm3, %v2444_v24, 0.0 }
 0x4fd   : > { %2486 = vadd.xlane.f32.xlu1 %v2485_v12 }
 0x4ff   : > { %2489 = vadd.xlane.f32.xlu0 %v2488_v50 }
 0x501   : > { %2492 = vadd.xlane.f32.xlu1 %v2491_v41 }
 0x56c   : > { %v2451_v62 = vpop.xlane.xlu0 %2450 }
 0x56d   : > { %v2799_v1 = vadd.f32 -3.675754, %v2451_v62 }
 0x570   : > { %v2448_v15 = vpop.xlane.xlu0 %2447 }
 0x571   : > { %v2798_v13 = vadd.f32 -3.675754, %v2448_v15 }
 0x572   : > { %v2454_v32 = vpop.xlane.xlu1 %2453 }
 0x573   : > { %2510 = vxpose.xlu0.b32.start [1/16] (narrow) %v2798_v13, 8  ;;  %v2800_v47 = vadd.f32 -3.675754, %v2454_v32 }
 0x576   : > { %v2457_v33 = vpop.xlane.xlu1 %2456  ;;  %v2460_v46 = vpop.xlane.xlu0 %2459 }
 0x577   : > { %2511 = vxpose.xlu0.b32.cont [2/16] (narrow) %v2799_v1, 8  ;;  %v2801_v27 = vadd.f32 -3.675754, %v2457_v33  ;;  %v2802_v22 = vadd.f32 -3.675754, %v2460_v46 }
 0x57a   : > { %v2463_v54 = vpop.xlane.xlu1 %2462  ;;  %v2466_v0 = vpop.xlane.xlu0 %2465 }
 0x57b   : > { %2512 = vxpose.xlu0.b32.cont [3/16] (narrow) %v2800_v47, 8  ;;  %v2803_v61 = vadd.f32 -3.675754, %v2463_v54  ;;  %v2804_v48 = vadd.f32 -3.675754, %v2466_v0 }
 0x57e   : > { %v2469_v55 = vpop.xlane.xlu1 %2468 }
 0x57f   : > { %2513 = vxpose.xlu0.b32.cont [4/16] (narrow) %v2801_v27, 8  ;;  %v2805_v40 = vadd.f32 -3.675754, %v2469_v55 }
 0x580   : > { %v2472_v31 = vpop.xlane.xlu0 %2471 }
 0x581   : > { %v2806_v60 = vadd.f32 -3.675754, %v2472_v31 }
 0x582   : > { %v2475_v51 = vpop.xlane.xlu1 %2474 }
 0x583   : > { %2514 = vxpose.xlu0.b32.cont [5/16] (narrow) %v2802_v22, 8  ;;  %v2807_v19 = vadd.f32 -3.675754, %v2475_v51 }
 0x584   : > { %v2478_v8 = vpop.xlane.xlu0 %2477 }
 0x585   : > { %v2808_v20 = vadd.f32 -3.675754, %v2478_v8 }
 0x586   : > { %v2481_v30 = vpop.xlane.xlu1 %2480 }
 0x587   : > { %2515 = vxpose.xlu0.b32.cont [6/16] (narrow) %v2803_v61, 8  ;;  %v2809_v6 = vadd.f32 -3.675754, %v2481_v30 }
 0x588   : > { %v2484_v42 = vpop.xlane.xlu0 %2483 }
 0x589   : > { %v2810_v56 = vadd.f32 -3.675754, %v2484_v42 }
 0x58a   : > { %v2487_v25 = vpop.xlane.xlu1 %2486 }
 0x58b   : > { %2516 = vxpose.xlu0.b32.cont [7/16] (narrow) %v2804_v48, 8  ;;  %v2811_v63 = vadd.f32 -3.675754, %v2487_v25 }
 0x58c   : > { %v2490_v18 = vpop.xlane.xlu0 %2489 }
 0x58d   : > { %v2812_v49 = vadd.f32 -3.675754, %v2490_v18 }
 0x58e   : > { %v2493_v36 = vpop.xlane.xlu1 %2492 }
 0x58f   : > { %2517 = vxpose.xlu0.b32.cont [8/16] (narrow) %v2805_v40, 8  ;;  %v2813_v16 = vadd.f32 -3.675754, %v2493_v36 }
 0x593   : > { %2518 = vxpose.xlu0.b32.cont [9/16] (narrow) %v2806_v60, 8 }
 0x597   : > { %2519 = vxpose.xlu0.b32.cont [10/16] (narrow) %v2807_v19, 8 }
 0x59b   : > { %2520 = vxpose.xlu0.b32.cont [11/16] (narrow) %v2808_v20, 8 }
 0x59f   : > { %2521 = vxpose.xlu0.b32.cont [12/16] (narrow) %v2809_v6, 8 }
 0x5a3   : > { %2522 = vxpose.xlu0.b32.cont [13/16] (narrow) %v2810_v56, 8 }
 0x5a7   : > { %2523 = vxpose.xlu0.b32.cont [14/16] (narrow) %v2811_v63, 8 }
 0x5ab   : > { %2524 = vxpose.xlu0.b32.cont [15/16] (narrow) %v2812_v49, 8 }
 0x5af   : > { %2525 = vxpose.xlu0.b32.end [16/16] (narrow) %v2813_v16, 8 }
 0x5f3   : > { %v2526_v44 = vpop.trf.xlu0 }
 0x5f4   : > { %2542 = vst [vmem:[%s249_s14] sm:$0x1] %v2526_v44 }
 0x5f5   : > { %3575 = shalt.err (!%p3572_p3)
}
 0x5f6   : > { %s3576_s9 = scalar_lea.hbm %s4633_s17, 16  ;;  %s3580_s8 = scalar_lea.hbm %s4678_s5, 32 }
 0x5f7   : > { %p3577_p4 = scmp.ne.s32.totalorder %s4633_s17, %s3576_s9  ;;  %p3581_p9 = scmp.lt.u32.totalorder %s4633_s17, %s4678_s5 }
 0x5f8   : > { %p3582_p10 = scmp.lt.u32.totalorder %s3580_s8, %s3576_s9  ;;  %p3584_p12 = scmp.lt.u32.totalorder %s3576_s9, %s4633_s17 }
 0x5f9   : > { %p3578_p7 = pnand %p3577_p4, %p3692_p5 }
 0x5fa   : > { %p3583_p11 = por %p3582_p10, %p3581_p9 }
 0x5fb   : > { %p3579_p8 = pneg %p3578_p7 }
 0x5fc   : > { %p3585_p13 = por %p3584_p12, %p3583_p11 }
 0x5fe   : > { %p3586_p0 = pnand %p3585_p13, %p3579_p8 }
 0x600   : > { %3589 = shalt.err (!%p3586_p0)
}
 0x601   : > { %3347 = dma.vmem_to_hbm [thread:$0]  (%p3692_p5), %s4627_s11, 16, %s4633_s17, %s2544_s22  }
 0x602 PF: > { %p3353_p1 = scmp.ge.s32.totalorder %s3624_s21, 2  ;;  %s2568_s10 = sand.u32 1, %s3612_s18  }
 0x603   : > { %s2569_s14 = scalar_lea.sflag [#allocation3], %s2568_s10 }
 0x604   : > { %p3350_p2 = pnand %p3353_p1, %p3696_p6 }
 0x606   : > { %3607 = dma.done.wait (!%p3350_p2), %s2569_s14, 16  }
 0x607   : > { %3609 = vsyncadd (!%p3350_p2), %s2569_s14, 4294967280  ;;  %p15_p3 = scmp.ge.s32.totalorder %s3680_s24, 4   ;;  %s4681_s18 = smov %s3616_s19 }
 0x608   : > { %s4682_s19 = smov %s3620_s20  ;;  %s4683_s20 = smov %s3690_s27 }
 0x609   : > { %s4684_s21 = smov %s3680_s24  ;;  %17 = sbr.rel (!%p15_p3) target bundleno = 3 (0x3), region = 81 }
 0x610   :  { %2573 = vsyncpa [#allocation3], 1 }
 0x611   :  { %2575 = vsyncpa [#allocation3 + $0x1], 1 }

</bundles_post_ra>
